<compile_context>
chip_gen: v7x
topology: tpu7x:2x2x1
jax: 0.10.0
libtpu: 0.0.40
codegen_flags: <defaults>
</compile_context>

<pallas_src>
import jax
import jax.numpy as jnp
from jax import lax
from jax.experimental import pallas as pl
from jax.experimental.pallas import tpu as pltpu

# ----------------------------- small synthetic CLIP-ViT config ---------------
IMG = 16          # image spatial size
PATCH = 8         # patch size (stride == kernel)
CH = 3            # input channels
D = 128           # hidden size   (real PLIP: 768)
HEADS = 4         # attention heads
HEAD_DIM = D // HEADS
INTER = 256       # MLP intermediate size
LAYERS = 2        # encoder layers (real PLIP: 12)
EPS = 1e-5
NUM_PATCHES = (IMG // PATCH) ** 2
SEQ = NUM_PATCHES + 1        # +1 for [CLS]
PATCH_K = CH * PATCH * PATCH


# ----------------------------- shared in-kernel helpers ----------------------
def _ln_f32(x, g, b):
    """Row-wise LayerNorm in f32.  x:[M,N], g/b:[1,N]."""
    mu = jnp.mean(x, axis=-1, keepdims=True)
    xc = x - mu
    var = jnp.mean(xc * xc, axis=-1, keepdims=True)
    return xc * lax.rsqrt(var + EPS) * g + b


# ----------------------------- kernel 1: patch embed + pos + pre-LN ----------
def _embed_kernel(x_ref, w_ref, cls_ref, pos_ref, g_ref, b_ref, o_ref):
    x = x_ref[0].astype(jnp.float32)                       # (NUM_PATCHES, K)
    w = w_ref[...].astype(jnp.float32)                     # (K, D)
    patches = jnp.dot(x, w, preferred_element_type=jnp.float32)
    emb = jnp.concatenate(
        [cls_ref[...].astype(jnp.float32), patches], axis=0)   # (SEQ, D)
    emb = emb + pos_ref[...].astype(jnp.float32)
    y = _ln_f32(emb, g_ref[...].astype(jnp.float32),
                b_ref[...].astype(jnp.float32))
    o_ref[0] = y.astype(o_ref.dtype)


def embed_pre_ln(x_patches, w_patch, class_emb, pos_emb, g, b):
    B = x_patches.shape[0]
    return pl.pallas_call(
        _embed_kernel,
        out_shape=jax.ShapeDtypeStruct((B, SEQ, D), x_patches.dtype),
        grid=(B,),
        in_specs=[
            pl.BlockSpec((1, NUM_PATCHES, PATCH_K), lambda i: (i, 0, 0)),
            pl.BlockSpec((PATCH_K, D), lambda i: (0, 0)),
            pl.BlockSpec((1, D), lambda i: (0, 0)),
            pl.BlockSpec((SEQ, D), lambda i: (0, 0)),
            pl.BlockSpec((1, D), lambda i: (0, 0)),
            pl.BlockSpec((1, D), lambda i: (0, 0)),
        ],
        out_specs=pl.BlockSpec((1, SEQ, D), lambda i: (i, 0, 0)),
        compiler_params=pltpu.CompilerParams(dimension_semantics=("parallel",)),
    )(x_patches, w_patch, class_emb, pos_emb, g, b)


# ----------------------------- kernel 2: fused attention residual block ------
def _attn_block_kernel(h_ref, g_ref, b_ref, wqkv_ref, bqkv_ref,
                       wo_ref, bo_ref, o_ref):
    h = h_ref[0].astype(jnp.float32)                       # (SEQ, D)
    xn = _ln_f32(h, g_ref[...].astype(jnp.float32),
                 b_ref[...].astype(jnp.float32))
    # Fused QKV projection; 1/sqrt(head_dim) is already folded into the q third
    # of wqkv / bqkv (done once at parameter-init time, not per call).
    qkv = jnp.dot(xn, wqkv_ref[...].astype(jnp.float32),
                  preferred_element_type=jnp.float32)
    qkv = qkv + bqkv_ref[...].astype(jnp.float32)          # (SEQ, 3D)

    heads_out = []
    for hidx in range(HEADS):                              # static unroll
        lo = hidx * HEAD_DIM
        q_h = qkv[:, lo:lo + HEAD_DIM]
        k_h = qkv[:, D + lo:D + lo + HEAD_DIM]
        v_h = qkv[:, 2 * D + lo:2 * D + lo + HEAD_DIM]
        # contract last dims directly (no explicit k transpose)
        s = lax.dot_general(q_h, k_h, (((1,), (1,)), ((), ())),
                            preferred_element_type=jnp.float32)   # (SEQ, SEQ)
        s = s - jnp.max(s, axis=-1, keepdims=True)
        p = jnp.exp(s)
        denom = jnp.sum(p, axis=-1, keepdims=True)
        o_h = jnp.dot(p, v_h, preferred_element_type=jnp.float32)  # (SEQ, hd)
        heads_out.append(o_h * pl.reciprocal(denom, approx=True))
    attn = jnp.concatenate(heads_out, axis=-1)             # (SEQ, D) lane-dense

    out = jnp.dot(attn, wo_ref[...].astype(jnp.float32),
                  preferred_element_type=jnp.float32)
    out = out + bo_ref[...].astype(jnp.float32)
    o_ref[0] = (h + out).astype(o_ref.dtype)               # residual add fused


def attn_block(h, g, b, wqkv, bqkv, wo, bo):
    B = h.shape[0]
    return pl.pallas_call(
        _attn_block_kernel,
        out_shape=jax.ShapeDtypeStruct((B, SEQ, D), h.dtype),
        grid=(B,),
        in_specs=[
            pl.BlockSpec((1, SEQ, D), lambda i: (i, 0, 0)),
            pl.BlockSpec((1, D), lambda i: (0, 0)),
            pl.BlockSpec((1, D), lambda i: (0, 0)),
            pl.BlockSpec((D, 3 * D), lambda i: (0, 0)),
            pl.BlockSpec((1, 3 * D), lambda i: (0, 0)),
            pl.BlockSpec((D, D), lambda i: (0, 0)),
            pl.BlockSpec((1, D), lambda i: (0, 0)),
        ],
        out_specs=pl.BlockSpec((1, SEQ, D), lambda i: (i, 0, 0)),
        compiler_params=pltpu.CompilerParams(dimension_semantics=("parallel",)),
    )(h, g, b, wqkv, bqkv, wo, bo)


# ----------------------------- kernel 3: fused MLP residual block ------------
def _mlp_block_kernel(h_ref, g_ref, b_ref, w1_ref, b1_ref, w2_ref, b2_ref,
                      o_ref):
    h = h_ref[0].astype(jnp.float32)                       # (SEQ, D)
    xn = _ln_f32(h, g_ref[...].astype(jnp.float32),
                 b_ref[...].astype(jnp.float32))
    z = jnp.dot(xn, w1_ref[...].astype(jnp.float32),
                preferred_element_type=jnp.float32)
    z = z + b1_ref[...].astype(jnp.float32)                # (SEQ, INTER)
    z = z * jax.nn.sigmoid(1.702 * z)                      # CLIP quick_gelu
    y = jnp.dot(z, w2_ref[...].astype(jnp.float32),
                preferred_element_type=jnp.float32)
    y = y + b2_ref[...].astype(jnp.float32)
    o_ref[0] = (h + y).astype(o_ref.dtype)                 # residual add fused


def mlp_block(h, g, b, w1, b1, w2, b2):
    B = h.shape[0]
    return pl.pallas_call(
        _mlp_block_kernel,
        out_shape=jax.ShapeDtypeStruct((B, SEQ, D), h.dtype),
        grid=(B,),
        in_specs=[
            pl.BlockSpec((1, SEQ, D), lambda i: (i, 0, 0)),
            pl.BlockSpec((1, D), lambda i: (0, 0)),
            pl.BlockSpec((1, D), lambda i: (0, 0)),
            pl.BlockSpec((D, INTER), lambda i: (0, 0)),
            pl.BlockSpec((1, INTER), lambda i: (0, 0)),
            pl.BlockSpec((INTER, D), lambda i: (0, 0)),
            pl.BlockSpec((1, D), lambda i: (0, 0)),
        ],
        out_specs=pl.BlockSpec((1, SEQ, D), lambda i: (i, 0, 0)),
        compiler_params=pltpu.CompilerParams(dimension_semantics=("parallel",)),
    )(h, g, b, w1, b1, w2, b2)


# ----------------------------- kernel 4: post-LN on pooled [CLS] -------------
def _pooled_ln_kernel(x_ref, g_ref, b_ref, o_ref):
    x = x_ref[...].astype(jnp.float32)
    o_ref[...] = _ln_f32(x, g_ref[...].astype(jnp.float32),
                         b_ref[...].astype(jnp.float32)).astype(o_ref.dtype)


def pooled_layernorm(x, g, b):
    M, N = x.shape
    return pl.pallas_call(
        _pooled_ln_kernel,
        out_shape=jax.ShapeDtypeStruct((M, N), x.dtype),
        grid=(1,),
        in_specs=[pl.BlockSpec((M, N), lambda i: (0, 0)),
                  pl.BlockSpec((1, N), lambda i: (0, 0)),
                  pl.BlockSpec((1, N), lambda i: (0, 0))],
        out_specs=pl.BlockSpec((M, N), lambda i: (0, 0)),
    )(x, g, b)


# ----------------------------- parameters ------------------------------------
def init_params(key):
    keys = iter(jax.random.split(key, 256))

    def nrm(shape, std=0.02):
        return std * jax.random.normal(next(keys), shape, dtype=jnp.float32)

    scale = HEAD_DIM ** -0.5
    params = {
        # Conv2d(CH, D, kernel=PATCH, stride=PATCH, bias=False) weight (PyTorch layout)
        "patch_w": nrm((D, CH, PATCH, PATCH)),
        "class_emb": nrm((D,)),
        "pos_emb": nrm((SEQ, D)),
        "pre_ln_g": jnp.ones((D,), jnp.float32), "pre_ln_b": jnp.zeros((D,), jnp.float32),
        "post_ln_g": jnp.ones((D,), jnp.float32), "post_ln_b": jnp.zeros((D,), jnp.float32),
        "layers": [],
    }
    for _ in range(LAYERS):
        # Linear weights stored pre-transposed ([in, out]) for x @ W.
        q_w, q_b = nrm((D, D)), nrm((D,))
        k_w, k_b = nrm((D, D)), nrm((D,))
        v_w, v_b = nrm((D, D)), nrm((D,))
        # Fuse QKV into one [D, 3D] weight, folding 1/sqrt(head_dim) into q.
        qkv_w = jnp.concatenate([q_w * scale, k_w, v_w], axis=1)
        qkv_b = jnp.concatenate([q_b * scale, k_b, v_b], axis=0)
        params["layers"].append({
            "ln1_g": jnp.ones((D,), jnp.float32), "ln1_b": jnp.zeros((D,), jnp.float32),
            "qkv_w": qkv_w, "qkv_b": qkv_b,
            "o_w": nrm((D, D)), "o_b": nrm((D,)),
            "ln2_g": jnp.ones((D,), jnp.float32), "ln2_b": jnp.zeros((D,), jnp.float32),
            "fc1_w": nrm((D, INTER)), "fc1_b": nrm((INTER,)),
            "fc2_w": nrm((INTER, D)), "fc2_b": nrm((D,)),
        })
    return params


# ----------------------------- forward (== PLIP.forward) ---------------------
def plip_vision_forward(params, images):
    """images: [B, 3, IMG, IMG] (NCHW, float32).

    Returns (last_hidden_state [B, SEQ, D], pooled_output [B, D]),
    mirroring CLIPVisionTransformer's BaseModelOutputWithPooling
    (post_layernorm applied to the pooled [CLS] token only).
    """
    B = images.shape[0]

    # --- patchify: stride==kernel conv == non-overlapping patch extraction ---
    x = images.reshape(B, CH, IMG // PATCH, PATCH, IMG // PATCH, PATCH)
    x = x.transpose(0, 2, 4, 1, 3, 5).reshape(B, NUM_PATCHES, PATCH_K)
    w_patch = params["patch_w"].reshape(D, PATCH_K).T       # [K, D]

    # --- fused patch-embed + [CLS] + pos-emb + pre-LN ---
    h = embed_pre_ln(x, w_patch,
                     params["class_emb"].reshape(1, D), params["pos_emb"],
                     params["pre_ln_g"].reshape(1, D),
                     params["pre_ln_b"].reshape(1, D))

    # --- pre-norm transformer encoder layers (2 fused kernels / layer) ---
    for lp in params["layers"]:
        h = attn_block(h,
                       lp["ln1_g"].reshape(1, D), lp["ln1_b"].reshape(1, D),
                       lp["qkv_w"], lp["qkv_b"].reshape(1, 3 * D),
                       lp["o_w"], lp["o_b"].reshape(1, D))
        h = mlp_block(h,
                      lp["ln2_g"].reshape(1, D), lp["ln2_b"].reshape(1, D),
                      lp["fc1_w"], lp["fc1_b"].reshape(1, INTER),
                      lp["fc2_w"], lp["fc2_b"].reshape(1, D))

    last_hidden_state = h
    pooled = pooled_layernorm(h[:, 0, :],
                              params["post_ln_g"].reshape(1, D),
                              params["post_ln_b"].reshape(1, D))
    return last_hidden_state, pooled


# ----------------------------- main -------------------------------------------
if __name__ == "__main__":
    key = jax.random.PRNGKey(0)
    k_param, k_img = jax.random.split(key)
    params = init_params(k_param)
    images = jax.random.normal(k_img, (2, CH, IMG, IMG), dtype=jnp.float32)

    fwd = jax.jit(plip_vision_forward)
    last_hidden, pooled = fwd(params, images)
    jax.block_until_ready((last_hidden, pooled))

    assert last_hidden.shape == (2, SEQ, D)
    assert pooled.shape == (2, D)
    assert bool(jnp.all(jnp.isfinite(last_hidden))) and bool(jnp.all(jnp.isfinite(pooled)))
    print("KERNEL_OK")
</pallas_src>

<mosaic_0001>
module attributes {stable_mosaic.version = 11 : i64} {
  func.func @_embed_kernel(%arg0: i32, %arg1: memref<1x4x192xf32, #tpu.memory_space<vmem>>, %arg2: memref<192x128xf32, #tpu.memory_space<vmem>>, %arg3: memref<1x128xf32, #tpu.memory_space<vmem>>, %arg4: memref<5x128xf32, #tpu.memory_space<vmem>>, %arg5: memref<1x128xf32, #tpu.memory_space<vmem>>, %arg6: memref<1x128xf32, #tpu.memory_space<vmem>>, %arg7: memref<1x5x128xf32, #tpu.memory_space<vmem>>) attributes {dimension_semantics = [#tpu.dimension_semantics<parallel>], iteration_bounds = array<i64: 2>, scalar_prefetch = 0 : i64, scratch_operands = 0 : i64, tpu.core_type = #tpu.core_type<tc>, window_params = [{transform_indices = @transform_0, window_bounds = array<i64: 1, 4, 192>}, {pipeline_mode = #tpu.pipeline_mode<synchronous>, transform_indices = @transform_1, window_bounds = array<i64: 192, 128>}, {pipeline_mode = #tpu.pipeline_mode<synchronous>, transform_indices = @transform_2, window_bounds = array<i64: 1, 128>}, {pipeline_mode = #tpu.pipeline_mode<synchronous>, transform_indices = @transform_3, window_bounds = array<i64: 5, 128>}, {pipeline_mode = #tpu.pipeline_mode<synchronous>, transform_indices = @transform_4, window_bounds = array<i64: 1, 128>}, {pipeline_mode = #tpu.pipeline_mode<synchronous>, transform_indices = @transform_5, window_bounds = array<i64: 1, 128>}, {transform_indices = @transform_6, window_bounds = array<i64: 1, 5, 128>}]} {
    %c0 = arith.constant 0 : index
    %c0_0 = arith.constant 0 : index
    %c0_1 = arith.constant 0 : index
    %0 = vector.load %arg1[%c0, %c0_0, %c0_1] : memref<1x4x192xf32, #tpu.memory_space<vmem>>, vector<1x4x192xf32>
    %1 = vector.shape_cast %0 : vector<1x4x192xf32> to vector<4x192xf32>
    %c0_2 = arith.constant 0 : index
    %c0_3 = arith.constant 0 : index
    %2 = vector.load %arg2[%c0_2, %c0_3] : memref<192x128xf32, #tpu.memory_space<vmem>>, vector<192x128xf32>
    %cst = arith.constant dense<0.000000e+00> : vector<4x128xf32>
    %3 = tpu.matmul %1, %2, %cst {dimension_numbers = #tpu.dot_dimension_numbers<[1], [0], [0], [1], [0, 0, 1, 1], [], []>} : vector<4x192xf32>, vector<192x128xf32>, vector<4x128xf32> -> vector<4x128xf32>
    %c0_4 = arith.constant 0 : index
    %c0_5 = arith.constant 0 : index
    %4 = vector.load %arg3[%c0_4, %c0_5] : memref<1x128xf32, #tpu.memory_space<vmem>>, vector<1x128xf32>
    %5 = tpu.concatenate %4, %3 in 0 : vector<1x128xf32>, vector<4x128xf32> -> vector<5x128xf32>
    %c0_6 = arith.constant 0 : index
    %c0_7 = arith.constant 0 : index
    %6 = vector.load %arg4[%c0_6, %c0_7] : memref<5x128xf32, #tpu.memory_space<vmem>>, vector<5x128xf32>
    %7 = arith.addf %5, %6 : vector<5x128xf32>
    %c0_8 = arith.constant 0 : index
    %c0_9 = arith.constant 0 : index
    %8 = vector.load %arg5[%c0_8, %c0_9] : memref<1x128xf32, #tpu.memory_space<vmem>>, vector<1x128xf32>
    %c0_10 = arith.constant 0 : index
    %c0_11 = arith.constant 0 : index
    %9 = vector.load %arg6[%c0_10, %c0_11] : memref<1x128xf32, #tpu.memory_space<vmem>>, vector<1x128xf32>
    %cst_12 = arith.constant dense<0.000000e+00> : vector<5xf32>
    %10 = vector.multi_reduction <add>, %7, %cst_12 [1] : vector<5x128xf32> to vector<5xf32>
    %11 = vector.shape_cast %10 : vector<5xf32> to vector<5x1xf32>
    %cst_13 = arith.constant 1.280000e+02 : f32
    %12 = vector.broadcast %cst_13 : f32 to vector<5x1xf32>
    %13 = arith.divf %11, %12 : vector<5x1xf32>
    %14 = vector.broadcast %13 : vector<5x1xf32> to vector<5x128xf32>
    %15 = arith.subf %7, %14 : vector<5x128xf32>
    %16 = arith.mulf %15, %15 : vector<5x128xf32>
    %cst_14 = arith.constant dense<0.000000e+00> : vector<5xf32>
    %17 = vector.multi_reduction <add>, %16, %cst_14 [1] : vector<5x128xf32> to vector<5xf32>
    %18 = vector.shape_cast %17 : vector<5xf32> to vector<5x1xf32>
    %cst_15 = arith.constant 1.280000e+02 : f32
    %19 = vector.broadcast %cst_15 : f32 to vector<5x1xf32>
    %20 = arith.divf %18, %19 : vector<5x1xf32>
    %cst_16 = arith.constant 9.99999974E-6 : f32
    %21 = vector.broadcast %cst_16 : f32 to vector<5x1xf32>
    %22 = arith.addf %20, %21 : vector<5x1xf32>
    %23 = math.rsqrt %22 : vector<5x1xf32>
    %24 = vector.broadcast %23 : vector<5x1xf32> to vector<5x128xf32>
    %25 = arith.mulf %15, %24 : vector<5x128xf32>
    %26 = vector.broadcast %8 : vector<1x128xf32> to vector<5x128xf32>
    %27 = arith.mulf %25, %26 : vector<5x128xf32>
    %28 = vector.broadcast %9 : vector<1x128xf32> to vector<5x128xf32>
    %29 = arith.addf %27, %28 : vector<5x128xf32>
    %c0_17 = arith.constant 0 : index
    %c0_18 = arith.constant 0 : index
    %c0_19 = arith.constant 0 : index
    %30 = vector.load %arg7[%c0_17, %c0_18, %c0_19] : memref<1x5x128xf32, #tpu.memory_space<vmem>>, vector<1x5x128xf32>
    %31 = vector.shape_cast %30 : vector<1x5x128xf32> to vector<5x128xf32>
    %32 = vector.shape_cast %29 : vector<5x128xf32> to vector<1x5x128xf32>
    tpu.vector_store %arg7[%c0_17, %c0_18, %c0_19], %32 {strides = array<i32>} : memref<1x5x128xf32, #tpu.memory_space<vmem>>, vector<1x5x128xf32>,
    return
  }
  func.func @transform_0(%arg0: i32) -> (i32, i32, i32) {
    %c0_i32 = arith.constant 0 : i32
    %c0_i32_0 = arith.constant 0 : i32
    %c0_i32_1 = arith.constant 0 : i32
    return %arg0, %c0_i32, %c0_i32_0 : i32, i32, i32
  }
  func.func @transform_1(%arg0: i32) -> (i32, i32) {
    %c0_i32 = arith.constant 0 : i32
    %c0_i32_0 = arith.constant 0 : i32
    %c0_i32_1 = arith.constant 0 : i32
    return %c0_i32, %c0_i32_0 : i32, i32
  }
  func.func @transform_2(%arg0: i32) -> (i32, i32) {
    %c0_i32 = arith.constant 0 : i32
    %c0_i32_0 = arith.constant 0 : i32
    %c0_i32_1 = arith.constant 0 : i32
    return %c0_i32, %c0_i32_0 : i32, i32
  }
  func.func @transform_3(%arg0: i32) -> (i32, i32) {
    %c0_i32 = arith.constant 0 : i32
    %c0_i32_0 = arith.constant 0 : i32
    %c0_i32_1 = arith.constant 0 : i32
    return %c0_i32, %c0_i32_0 : i32, i32
  }
  func.func @transform_4(%arg0: i32) -> (i32, i32) {
    %c0_i32 = arith.constant 0 : i32
    %c0_i32_0 = arith.constant 0 : i32
    %c0_i32_1 = arith.constant 0 : i32
    return %c0_i32, %c0_i32_0 : i32, i32
  }
  func.func @transform_5(%arg0: i32) -> (i32, i32) {
    %c0_i32 = arith.constant 0 : i32
    %c0_i32_0 = arith.constant 0 : i32
    %c0_i32_1 = arith.constant 0 : i32
    return %c0_i32, %c0_i32_0 : i32, i32
  }
  func.func @transform_6(%arg0: i32) -> (i32, i32, i32) {
    %c0_i32 = arith.constant 0 : i32
    %c0_i32_0 = arith.constant 0 : i32
    %c0_i32_1 = arith.constant 0 : i32
    return %arg0, %c0_i32, %c0_i32_0 : i32, i32, i32
  }
}

module attributes {stable_mosaic.version = 11 : i64} {
  func.func @_attn_block_kernel(%arg0: i32, %arg1: memref<1x5x128xf32, #tpu.memory_space<vmem>>, %arg2: memref<1x128xf32, #tpu.memory_space<vmem>>, %arg3: memref<1x128xf32, #tpu.memory_space<vmem>>, %arg4: memref<128x384xf32, #tpu.memory_space<vmem>>, %arg5: memref<1x384xf32, #tpu.memory_space<vmem>>, %arg6: memref<128x128xf32, #tpu.memory_space<vmem>>, %arg7: memref<1x128xf32, #tpu.memory_space<vmem>>, %arg8: memref<1x5x128xf32, #tpu.memory_space<vmem>>) attributes {dimension_semantics = [#tpu.dimension_semantics<parallel>], iteration_bounds = array<i64: 2>, scalar_prefetch = 0 : i64, scratch_operands = 0 : i64, tpu.core_type = #tpu.core_type<tc>, window_params = [{transform_indices = @transform_0, window_bounds = array<i64: 1, 5, 128>}, {pipeline_mode = #tpu.pipeline_mode<synchronous>, transform_indices = @transform_1, window_bounds = array<i64: 1, 128>}, {pipeline_mode = #tpu.pipeline_mode<synchronous>, transform_indices = @transform_2, window_bounds = array<i64: 1, 128>}, {pipeline_mode = #tpu.pipeline_mode<synchronous>, transform_indices = @transform_3, window_bounds = array<i64: 128, 384>}, {pipeline_mode = #tpu.pipeline_mode<synchronous>, transform_indices = @transform_4, window_bounds = array<i64: 1, 384>}, {pipeline_mode = #tpu.pipeline_mode<synchronous>, transform_indices = @transform_5, window_bounds = array<i64: 128, 128>}, {pipeline_mode = #tpu.pipeline_mode<synchronous>, transform_indices = @transform_6, window_bounds = array<i64: 1, 128>}, {transform_indices = @transform_7, window_bounds = array<i64: 1, 5, 128>}]} {
    %c0 = arith.constant 0 : index
    %c0_0 = arith.constant 0 : index
    %c0_1 = arith.constant 0 : index
    %0 = vector.load %arg1[%c0, %c0_0, %c0_1] : memref<1x5x128xf32, #tpu.memory_space<vmem>>, vector<1x5x128xf32>
    %1 = vector.shape_cast %0 : vector<1x5x128xf32> to vector<5x128xf32>
    %c0_2 = arith.constant 0 : index
    %c0_3 = arith.constant 0 : index
    %2 = vector.load %arg2[%c0_2, %c0_3] : memref<1x128xf32, #tpu.memory_space<vmem>>, vector<1x128xf32>
    %c0_4 = arith.constant 0 : index
    %c0_5 = arith.constant 0 : index
    %3 = vector.load %arg3[%c0_4, %c0_5] : memref<1x128xf32, #tpu.memory_space<vmem>>, vector<1x128xf32>
    %cst = arith.constant dense<0.000000e+00> : vector<5xf32>
    %4 = vector.multi_reduction <add>, %1, %cst [1] : vector<5x128xf32> to vector<5xf32>
    %5 = vector.shape_cast %4 : vector<5xf32> to vector<5x1xf32>
    %cst_6 = arith.constant 1.280000e+02 : f32
    %6 = vector.broadcast %cst_6 : f32 to vector<5x1xf32>
    %7 = arith.divf %5, %6 : vector<5x1xf32>
    %8 = vector.broadcast %7 : vector<5x1xf32> to vector<5x128xf32>
    %9 = arith.subf %1, %8 : vector<5x128xf32>
    %10 = arith.mulf %9, %9 : vector<5x128xf32>
    %cst_7 = arith.constant dense<0.000000e+00> : vector<5xf32>
    %11 = vector.multi_reduction <add>, %10, %cst_7 [1] : vector<5x128xf32> to vector<5xf32>
    %12 = vector.shape_cast %11 : vector<5xf32> to vector<5x1xf32>
    %cst_8 = arith.constant 1.280000e+02 : f32
    %13 = vector.broadcast %cst_8 : f32 to vector<5x1xf32>
    %14 = arith.divf %12, %13 : vector<5x1xf32>
    %cst_9 = arith.constant 9.99999974E-6 : f32
    %15 = vector.broadcast %cst_9 : f32 to vector<5x1xf32>
    %16 = arith.addf %14, %15 : vector<5x1xf32>
    %17 = math.rsqrt %16 : vector<5x1xf32>
    %18 = vector.broadcast %17 : vector<5x1xf32> to vector<5x128xf32>
    %19 = arith.mulf %9, %18 : vector<5x128xf32>
    %20 = vector.broadcast %2 : vector<1x128xf32> to vector<5x128xf32>
    %21 = arith.mulf %19, %20 : vector<5x128xf32>
    %22 = vector.broadcast %3 : vector<1x128xf32> to vector<5x128xf32>
    %23 = arith.addf %21, %22 : vector<5x128xf32>
    %c0_10 = arith.constant 0 : index
    %c0_11 = arith.constant 0 : index
    %24 = vector.load %arg4[%c0_10, %c0_11] : memref<128x384xf32, #tpu.memory_space<vmem>>, vector<128x384xf32>
    %cst_12 = arith.constant dense<0.000000e+00> : vector<5x384xf32>
    %25 = tpu.matmul %23, %24, %cst_12 {dimension_numbers = #tpu.dot_dimension_numbers<[1], [0], [0], [1], [0, 0, 1, 1], [], []>} : vector<5x128xf32>, vector<128x384xf32>, vector<5x384xf32> -> vector<5x384xf32>
    %c0_13 = arith.constant 0 : index
    %c0_14 = arith.constant 0 : index
    %26 = vector.load %arg5[%c0_13, %c0_14] : memref<1x384xf32, #tpu.memory_space<vmem>>, vector<1x384xf32>
    %27 = vector.broadcast %26 : vector<1x384xf32> to vector<5x384xf32>
    %28 = arith.addf %25, %27 : vector<5x384xf32>
    %29 = vector.extract_strided_slice %28 {offsets = [0, 0], sizes = [5, 32], strides = [1, 1]} : vector<5x384xf32> to vector<5x32xf32>
    %30 = vector.extract_strided_slice %28 {offsets = [0, 128], sizes = [5, 32], strides = [1, 1]} : vector<5x384xf32> to vector<5x32xf32>
    %31 = vector.extract_strided_slice %28 {offsets = [0, 256], sizes = [5, 32], strides = [1, 1]} : vector<5x384xf32> to vector<5x32xf32>
    %cst_15 = arith.constant dense<0.000000e+00> : vector<5x5xf32>
    %32 = tpu.matmul %29, %30, %cst_15 {dimension_numbers = #tpu.dot_dimension_numbers<[1], [1], [0], [0], [0, 0, 1, 0], [], []>} : vector<5x32xf32>, vector<5x32xf32>, vector<5x5xf32> -> vector<5x5xf32>
    %cst_16 = arith.constant dense<0xFF800000> : vector<5xf32>
    %33 = vector.multi_reduction <maximumf>, %32, %cst_16 [1] : vector<5x5xf32> to vector<5xf32>
    %34 = vector.shape_cast %33 : vector<5xf32> to vector<5x1xf32>
    %35 = vector.broadcast %34 : vector<5x1xf32> to vector<5x5xf32>
    %36 = arith.subf %32, %35 : vector<5x5xf32>
    %37 = math.exp %36 : vector<5x5xf32>
    %cst_17 = arith.constant dense<0.000000e+00> : vector<5xf32>
    %38 = vector.multi_reduction <add>, %37, %cst_17 [1] : vector<5x5xf32> to vector<5xf32>
    %39 = vector.shape_cast %38 : vector<5xf32> to vector<5x1xf32>
    %cst_18 = arith.constant dense<0.000000e+00> : vector<5x32xf32>
    %40 = tpu.matmul %37, %31, %cst_18 {dimension_numbers = #tpu.dot_dimension_numbers<[1], [0], [0], [1], [0, 0, 1, 1], [], []>} : vector<5x5xf32>, vector<5x32xf32>, vector<5x32xf32> -> vector<5x32xf32>
    %41 = tpu.reciprocal %39 {approx = true} : vector<5x1xf32> -> vector<5x1xf32>
    %42 = vector.broadcast %41 : vector<5x1xf32> to vector<5x32xf32>
    %43 = arith.mulf %40, %42 : vector<5x32xf32>
    %44 = vector.extract_strided_slice %28 {offsets = [0, 32], sizes = [5, 32], strides = [1, 1]} : vector<5x384xf32> to vector<5x32xf32>
    %45 = vector.extract_strided_slice %28 {offsets = [0, 160], sizes = [5, 32], strides = [1, 1]} : vector<5x384xf32> to vector<5x32xf32>
    %46 = vector.extract_strided_slice %28 {offsets = [0, 288], sizes = [5, 32], strides = [1, 1]} : vector<5x384xf32> to vector<5x32xf32>
    %cst_19 = arith.constant dense<0.000000e+00> : vector<5x5xf32>
    %47 = tpu.matmul %44, %45, %cst_19 {dimension_numbers = #tpu.dot_dimension_numbers<[1], [1], [0], [0], [0, 0, 1, 0], [], []>} : vector<5x32xf32>, vector<5x32xf32>, vector<5x5xf32> -> vector<5x5xf32>
    %cst_20 = arith.constant dense<0xFF800000> : vector<5xf32>
    %48 = vector.multi_reduction <maximumf>, %47, %cst_20 [1] : vector<5x5xf32> to vector<5xf32>
    %49 = vector.shape_cast %48 : vector<5xf32> to vector<5x1xf32>
    %50 = vector.broadcast %49 : vector<5x1xf32> to vector<5x5xf32>
    %51 = arith.subf %47, %50 : vector<5x5xf32>
    %52 = math.exp %51 : vector<5x5xf32>
    %cst_21 = arith.constant dense<0.000000e+00> : vector<5xf32>
    %53 = vector.multi_reduction <add>, %52, %cst_21 [1] : vector<5x5xf32> to vector<5xf32>
    %54 = vector.shape_cast %53 : vector<5xf32> to vector<5x1xf32>
    %cst_22 = arith.constant dense<0.000000e+00> : vector<5x32xf32>
    %55 = tpu.matmul %52, %46, %cst_22 {dimension_numbers = #tpu.dot_dimension_numbers<[1], [0], [0], [1], [0, 0, 1, 1], [], []>} : vector<5x5xf32>, vector<5x32xf32>, vector<5x32xf32> -> vector<5x32xf32>
    %56 = tpu.reciprocal %54 {approx = true} : vector<5x1xf32> -> vector<5x1xf32>
    %57 = vector.broadcast %56 : vector<5x1xf32> to vector<5x32xf32>
    %58 = arith.mulf %55, %57 : vector<5x32xf32>
    %59 = vector.extract_strided_slice %28 {offsets = [0, 64], sizes = [5, 32], strides = [1, 1]} : vector<5x384xf32> to vector<5x32xf32>
    %60 = vector.extract_strided_slice %28 {offsets = [0, 192], sizes = [5, 32], strides = [1, 1]} : vector<5x384xf32> to vector<5x32xf32>
    %61 = vector.extract_strided_slice %28 {offsets = [0, 320], sizes = [5, 32], strides = [1, 1]} : vector<5x384xf32> to vector<5x32xf32>
    %cst_23 = arith.constant dense<0.000000e+00> : vector<5x5xf32>
    %62 = tpu.matmul %59, %60, %cst_23 {dimension_numbers = #tpu.dot_dimension_numbers<[1], [1], [0], [0], [0, 0, 1, 0], [], []>} : vector<5x32xf32>, vector<5x32xf32>, vector<5x5xf32> -> vector<5x5xf32>
    %cst_24 = arith.constant dense<0xFF800000> : vector<5xf32>
    %63 = vector.multi_reduction <maximumf>, %62, %cst_24 [1] : vector<5x5xf32> to vector<5xf32>
    %64 = vector.shape_cast %63 : vector<5xf32> to vector<5x1xf32>
    %65 = vector.broadcast %64 : vector<5x1xf32> to vector<5x5xf32>
    %66 = arith.subf %62, %65 : vector<5x5xf32>
    %67 = math.exp %66 : vector<5x5xf32>
    %cst_25 = arith.constant dense<0.000000e+00> : vector<5xf32>
    %68 = vector.multi_reduction <add>, %67, %cst_25 [1] : vector<5x5xf32> to vector<5xf32>
    %69 = vector.shape_cast %68 : vector<5xf32> to vector<5x1xf32>
    %cst_26 = arith.constant dense<0.000000e+00> : vector<5x32xf32>
    %70 = tpu.matmul %67, %61, %cst_26 {dimension_numbers = #tpu.dot_dimension_numbers<[1], [0], [0], [1], [0, 0, 1, 1], [], []>} : vector<5x5xf32>, vector<5x32xf32>, vector<5x32xf32> -> vector<5x32xf32>
    %71 = tpu.reciprocal %69 {approx = true} : vector<5x1xf32> -> vector<5x1xf32>
    %72 = vector.broadcast %71 : vector<5x1xf32> to vector<5x32xf32>
    %73 = arith.mulf %70, %72 : vector<5x32xf32>
    %74 = vector.extract_strided_slice %28 {offsets = [0, 96], sizes = [5, 32], strides = [1, 1]} : vector<5x384xf32> to vector<5x32xf32>
    %75 = vector.extract_strided_slice %28 {offsets = [0, 224], sizes = [5, 32], strides = [1, 1]} : vector<5x384xf32> to vector<5x32xf32>
    %76 = vector.extract_strided_slice %28 {offsets = [0, 352], sizes = [5, 32], strides = [1, 1]} : vector<5x384xf32> to vector<5x32xf32>
    %cst_27 = arith.constant dense<0.000000e+00> : vector<5x5xf32>
    %77 = tpu.matmul %74, %75, %cst_27 {dimension_numbers = #tpu.dot_dimension_numbers<[1], [1], [0], [0], [0, 0, 1, 0], [], []>} : vector<5x32xf32>, vector<5x32xf32>, vector<5x5xf32> -> vector<5x5xf32>
    %cst_28 = arith.constant dense<0xFF800000> : vector<5xf32>
    %78 = vector.multi_reduction <maximumf>, %77, %cst_28 [1] : vector<5x5xf32> to vector<5xf32>
    %79 = vector.shape_cast %78 : vector<5xf32> to vector<5x1xf32>
    %80 = vector.broadcast %79 : vector<5x1xf32> to vector<5x5xf32>
    %81 = arith.subf %77, %80 : vector<5x5xf32>
    %82 = math.exp %81 : vector<5x5xf32>
    %cst_29 = arith.constant dense<0.000000e+00> : vector<5xf32>
    %83 = vector.multi_reduction <add>, %82, %cst_29 [1] : vector<5x5xf32> to vector<5xf32>
    %84 = vector.shape_cast %83 : vector<5xf32> to vector<5x1xf32>
    %cst_30 = arith.constant dense<0.000000e+00> : vector<5x32xf32>
    %85 = tpu.matmul %82, %76, %cst_30 {dimension_numbers = #tpu.dot_dimension_numbers<[1], [0], [0], [1], [0, 0, 1, 1], [], []>} : vector<5x5xf32>, vector<5x32xf32>, vector<5x32xf32> -> vector<5x32xf32>
    %86 = tpu.reciprocal %84 {approx = true} : vector<5x1xf32> -> vector<5x1xf32>
    %87 = vector.broadcast %86 : vector<5x1xf32> to vector<5x32xf32>
    %88 = arith.mulf %85, %87 : vector<5x32xf32>
    %89 = tpu.concatenate %43, %58, %73, %88 in 1 : vector<5x32xf32>, vector<5x32xf32>, vector<5x32xf32>, vector<5x32xf32> -> vector<5x128xf32>
    %c0_31 = arith.constant 0 : index
    %c0_32 = arith.constant 0 : index
    %90 = vector.load %arg6[%c0_31, %c0_32] : memref<128x128xf32, #tpu.memory_space<vmem>>, vector<128x128xf32>
    %cst_33 = arith.constant dense<0.000000e+00> : vector<5x128xf32>
    %91 = tpu.matmul %89, %90, %cst_33 {dimension_numbers = #tpu.dot_dimension_numbers<[1], [0], [0], [1], [0, 0, 1, 1], [], []>} : vector<5x128xf32>, vector<128x128xf32>, vector<5x128xf32> -> vector<5x128xf32>
    %c0_34 = arith.constant 0 : index
    %c0_35 = arith.constant 0 : index
    %92 = vector.load %arg7[%c0_34, %c0_35] : memref<1x128xf32, #tpu.memory_space<vmem>>, vector<1x128xf32>
    %93 = vector.broadcast %92 : vector<1x128xf32> to vector<5x128xf32>
    %94 = arith.addf %91, %93 : vector<5x128xf32>
    %95 = arith.addf %1, %94 : vector<5x128xf32>
    %c0_36 = arith.constant 0 : index
    %c0_37 = arith.constant 0 : index
    %c0_38 = arith.constant 0 : index
    %96 = vector.load %arg8[%c0_36, %c0_37, %c0_38] : memref<1x5x128xf32, #tpu.memory_space<vmem>>, vector<1x5x128xf32>
    %97 = vector.shape_cast %96 : vector<1x5x128xf32> to vector<5x128xf32>
    %98 = vector.shape_cast %95 : vector<5x128xf32> to vector<1x5x128xf32>
    tpu.vector_store %arg8[%c0_36, %c0_37, %c0_38], %98 {strides = array<i32>} : memref<1x5x128xf32, #tpu.memory_space<vmem>>, vector<1x5x128xf32>,
    return
  }
  func.func @transform_0(%arg0: i32) -> (i32, i32, i32) {
    %c0_i32 = arith.constant 0 : i32
    %c0_i32_0 = arith.constant 0 : i32
    %c0_i32_1 = arith.constant 0 : i32
    return %arg0, %c0_i32, %c0_i32_0 : i32, i32, i32
  }
  func.func @transform_1(%arg0: i32) -> (i32, i32) {
    %c0_i32 = arith.constant 0 : i32
    %c0_i32_0 = arith.constant 0 : i32
    %c0_i32_1 = arith.constant 0 : i32
    return %c0_i32, %c0_i32_0 : i32, i32
  }
  func.func @transform_2(%arg0: i32) -> (i32, i32) {
    %c0_i32 = arith.constant 0 : i32
    %c0_i32_0 = arith.constant 0 : i32
    %c0_i32_1 = arith.constant 0 : i32
    return %c0_i32, %c0_i32_0 : i32, i32
  }
  func.func @transform_3(%arg0: i32) -> (i32, i32) {
    %c0_i32 = arith.constant 0 : i32
    %c0_i32_0 = arith.constant 0 : i32
    %c0_i32_1 = arith.constant 0 : i32
    return %c0_i32, %c0_i32_0 : i32, i32
  }
  func.func @transform_4(%arg0: i32) -> (i32, i32) {
    %c0_i32 = arith.constant 0 : i32
    %c0_i32_0 = arith.constant 0 : i32
    %c0_i32_1 = arith.constant 0 : i32
    return %c0_i32, %c0_i32_0 : i32, i32
  }
  func.func @transform_5(%arg0: i32) -> (i32, i32) {
    %c0_i32 = arith.constant 0 : i32
    %c0_i32_0 = arith.constant 0 : i32
    %c0_i32_1 = arith.constant 0 : i32
    return %c0_i32, %c0_i32_0 : i32, i32
  }
  func.func @transform_6(%arg0: i32) -> (i32, i32) {
    %c0_i32 = arith.constant 0 : i32
    %c0_i32_0 = arith.constant 0 : i32
    %c0_i32_1 = arith.constant 0 : i32
    return %c0_i32, %c0_i32_0 : i32, i32
  }
  func.func @transform_7(%arg0: i32) -> (i32, i32, i32) {
    %c0_i32 = arith.constant 0 : i32
    %c0_i32_0 = arith.constant 0 : i32
    %c0_i32_1 = arith.constant 0 : i32
    return %arg0, %c0_i32, %c0_i32_0 : i32, i32, i32
  }
}

module attributes {stable_mosaic.version = 11 : i64} {
  func.func @_mlp_block_kernel(%arg0: i32, %arg1: memref<1x5x128xf32, #tpu.memory_space<vmem>>, %arg2: memref<1x128xf32, #tpu.memory_space<vmem>>, %arg3: memref<1x128xf32, #tpu.memory_space<vmem>>, %arg4: memref<128x256xf32, #tpu.memory_space<vmem>>, %arg5: memref<1x256xf32, #tpu.memory_space<vmem>>, %arg6: memref<256x128xf32, #tpu.memory_space<vmem>>, %arg7: memref<1x128xf32, #tpu.memory_space<vmem>>, %arg8: memref<1x5x128xf32, #tpu.memory_space<vmem>>) attributes {dimension_semantics = [#tpu.dimension_semantics<parallel>], iteration_bounds = array<i64: 2>, scalar_prefetch = 0 : i64, scratch_operands = 0 : i64, tpu.core_type = #tpu.core_type<tc>, window_params = [{transform_indices = @transform_0, window_bounds = array<i64: 1, 5, 128>}, {pipeline_mode = #tpu.pipeline_mode<synchronous>, transform_indices = @transform_1, window_bounds = array<i64: 1, 128>}, {pipeline_mode = #tpu.pipeline_mode<synchronous>, transform_indices = @transform_2, window_bounds = array<i64: 1, 128>}, {pipeline_mode = #tpu.pipeline_mode<synchronous>, transform_indices = @transform_3, window_bounds = array<i64: 128, 256>}, {pipeline_mode = #tpu.pipeline_mode<synchronous>, transform_indices = @transform_4, window_bounds = array<i64: 1, 256>}, {pipeline_mode = #tpu.pipeline_mode<synchronous>, transform_indices = @transform_5, window_bounds = array<i64: 256, 128>}, {pipeline_mode = #tpu.pipeline_mode<synchronous>, transform_indices = @transform_6, window_bounds = array<i64: 1, 128>}, {transform_indices = @transform_7, window_bounds = array<i64: 1, 5, 128>}]} {
    %c0 = arith.constant 0 : index
    %c0_0 = arith.constant 0 : index
    %c0_1 = arith.constant 0 : index
    %0 = vector.load %arg1[%c0, %c0_0, %c0_1] : memref<1x5x128xf32, #tpu.memory_space<vmem>>, vector<1x5x128xf32>
    %1 = vector.shape_cast %0 : vector<1x5x128xf32> to vector<5x128xf32>
    %c0_2 = arith.constant 0 : index
    %c0_3 = arith.constant 0 : index
    %2 = vector.load %arg2[%c0_2, %c0_3] : memref<1x128xf32, #tpu.memory_space<vmem>>, vector<1x128xf32>
    %c0_4 = arith.constant 0 : index
    %c0_5 = arith.constant 0 : index
    %3 = vector.load %arg3[%c0_4, %c0_5] : memref<1x128xf32, #tpu.memory_space<vmem>>, vector<1x128xf32>
    %cst = arith.constant dense<0.000000e+00> : vector<5xf32>
    %4 = vector.multi_reduction <add>, %1, %cst [1] : vector<5x128xf32> to vector<5xf32>
    %5 = vector.shape_cast %4 : vector<5xf32> to vector<5x1xf32>
    %cst_6 = arith.constant 1.280000e+02 : f32
    %6 = vector.broadcast %cst_6 : f32 to vector<5x1xf32>
    %7 = arith.divf %5, %6 : vector<5x1xf32>
    %8 = vector.broadcast %7 : vector<5x1xf32> to vector<5x128xf32>
    %9 = arith.subf %1, %8 : vector<5x128xf32>
    %10 = arith.mulf %9, %9 : vector<5x128xf32>
    %cst_7 = arith.constant dense<0.000000e+00> : vector<5xf32>
    %11 = vector.multi_reduction <add>, %10, %cst_7 [1] : vector<5x128xf32> to vector<5xf32>
    %12 = vector.shape_cast %11 : vector<5xf32> to vector<5x1xf32>
    %cst_8 = arith.constant 1.280000e+02 : f32
    %13 = vector.broadcast %cst_8 : f32 to vector<5x1xf32>
    %14 = arith.divf %12, %13 : vector<5x1xf32>
    %cst_9 = arith.constant 9.99999974E-6 : f32
    %15 = vector.broadcast %cst_9 : f32 to vector<5x1xf32>
    %16 = arith.addf %14, %15 : vector<5x1xf32>
    %17 = math.rsqrt %16 : vector<5x1xf32>
    %18 = vector.broadcast %17 : vector<5x1xf32> to vector<5x128xf32>
    %19 = arith.mulf %9, %18 : vector<5x128xf32>
    %20 = vector.broadcast %2 : vector<1x128xf32> to vector<5x128xf32>
    %21 = arith.mulf %19, %20 : vector<5x128xf32>
    %22 = vector.broadcast %3 : vector<1x128xf32> to vector<5x128xf32>
    %23 = arith.addf %21, %22 : vector<5x128xf32>
    %c0_10 = arith.constant 0 : index
    %c0_11 = arith.constant 0 : index
    %24 = vector.load %arg4[%c0_10, %c0_11] : memref<128x256xf32, #tpu.memory_space<vmem>>, vector<128x256xf32>
    %cst_12 = arith.constant dense<0.000000e+00> : vector<5x256xf32>
    %25 = tpu.matmul %23, %24, %cst_12 {dimension_numbers = #tpu.dot_dimension_numbers<[1], [0], [0], [1], [0, 0, 1, 1], [], []>} : vector<5x128xf32>, vector<128x256xf32>, vector<5x256xf32> -> vector<5x256xf32>
    %c0_13 = arith.constant 0 : index
    %c0_14 = arith.constant 0 : index
    %26 = vector.load %arg5[%c0_13, %c0_14] : memref<1x256xf32, #tpu.memory_space<vmem>>, vector<1x256xf32>
    %27 = vector.broadcast %26 : vector<1x256xf32> to vector<5x256xf32>
    %28 = arith.addf %25, %27 : vector<5x256xf32>
    %cst_15 = arith.constant 1.702000e+00 : f32
    %29 = vector.broadcast %cst_15 : f32 to vector<5x256xf32>
    %30 = arith.mulf %29, %28 : vector<5x256xf32>
    %31 = arith.negf %30 : vector<5x256xf32>
    %32 = math.exp %31 : vector<5x256xf32>
    %cst_16 = arith.constant 1.000000e+00 : f32
    %33 = vector.broadcast %cst_16 : f32 to vector<5x256xf32>
    %34 = arith.addf %33, %32 : vector<5x256xf32>
    %35 = arith.divf %33, %34 : vector<5x256xf32>
    %36 = arith.mulf %28, %35 : vector<5x256xf32>
    %c0_17 = arith.constant 0 : index
    %c0_18 = arith.constant 0 : index
    %37 = vector.load %arg6[%c0_17, %c0_18] : memref<256x128xf32, #tpu.memory_space<vmem>>, vector<256x128xf32>
    %cst_19 = arith.constant dense<0.000000e+00> : vector<5x128xf32>
    %38 = tpu.matmul %36, %37, %cst_19 {dimension_numbers = #tpu.dot_dimension_numbers<[1], [0], [0], [1], [0, 0, 1, 1], [], []>} : vector<5x256xf32>, vector<256x128xf32>, vector<5x128xf32> -> vector<5x128xf32>
    %c0_20 = arith.constant 0 : index
    %c0_21 = arith.constant 0 : index
    %39 = vector.load %arg7[%c0_20, %c0_21] : memref<1x128xf32, #tpu.memory_space<vmem>>, vector<1x128xf32>
    %40 = vector.broadcast %39 : vector<1x128xf32> to vector<5x128xf32>
    %41 = arith.addf %38, %40 : vector<5x128xf32>
    %42 = arith.addf %1, %41 : vector<5x128xf32>
    %c0_22 = arith.constant 0 : index
    %c0_23 = arith.constant 0 : index
    %c0_24 = arith.constant 0 : index
    %43 = vector.load %arg8[%c0_22, %c0_23, %c0_24] : memref<1x5x128xf32, #tpu.memory_space<vmem>>, vector<1x5x128xf32>
    %44 = vector.shape_cast %43 : vector<1x5x128xf32> to vector<5x128xf32>
    %45 = vector.shape_cast %42 : vector<5x128xf32> to vector<1x5x128xf32>
    tpu.vector_store %arg8[%c0_22, %c0_23, %c0_24], %45 {strides = array<i32>} : memref<1x5x128xf32, #tpu.memory_space<vmem>>, vector<1x5x128xf32>,
    return
  }
  func.func @transform_0(%arg0: i32) -> (i32, i32, i32) {
    %c0_i32 = arith.constant 0 : i32
    %c0_i32_0 = arith.constant 0 : i32
    %c0_i32_1 = arith.constant 0 : i32
    return %arg0, %c0_i32, %c0_i32_0 : i32, i32, i32
  }
  func.func @transform_1(%arg0: i32) -> (i32, i32) {
    %c0_i32 = arith.constant 0 : i32
    %c0_i32_0 = arith.constant 0 : i32
    %c0_i32_1 = arith.constant 0 : i32
    return %c0_i32, %c0_i32_0 : i32, i32
  }
  func.func @transform_2(%arg0: i32) -> (i32, i32) {
    %c0_i32 = arith.constant 0 : i32
    %c0_i32_0 = arith.constant 0 : i32
    %c0_i32_1 = arith.constant 0 : i32
    return %c0_i32, %c0_i32_0 : i32, i32
  }
  func.func @transform_3(%arg0: i32) -> (i32, i32) {
    %c0_i32 = arith.constant 0 : i32
    %c0_i32_0 = arith.constant 0 : i32
    %c0_i32_1 = arith.constant 0 : i32
    return %c0_i32, %c0_i32_0 : i32, i32
  }
  func.func @transform_4(%arg0: i32) -> (i32, i32) {
    %c0_i32 = arith.constant 0 : i32
    %c0_i32_0 = arith.constant 0 : i32
    %c0_i32_1 = arith.constant 0 : i32
    return %c0_i32, %c0_i32_0 : i32, i32
  }
  func.func @transform_5(%arg0: i32) -> (i32, i32) {
    %c0_i32 = arith.constant 0 : i32
    %c0_i32_0 = arith.constant 0 : i32
    %c0_i32_1 = arith.constant 0 : i32
    return %c0_i32, %c0_i32_0 : i32, i32
  }
  func.func @transform_6(%arg0: i32) -> (i32, i32) {
    %c0_i32 = arith.constant 0 : i32
    %c0_i32_0 = arith.constant 0 : i32
    %c0_i32_1 = arith.constant 0 : i32
    return %c0_i32, %c0_i32_0 : i32, i32
  }
  func.func @transform_7(%arg0: i32) -> (i32, i32, i32) {
    %c0_i32 = arith.constant 0 : i32
    %c0_i32_0 = arith.constant 0 : i32
    %c0_i32_1 = arith.constant 0 : i32
    return %arg0, %c0_i32, %c0_i32_0 : i32, i32, i32
  }
}

module attributes {stable_mosaic.version = 11 : i64} {
  func.func @_pooled_ln_kernel(%arg0: i32, %arg1: memref<2x128xf32, #tpu.memory_space<vmem>>, %arg2: memref<1x128xf32, #tpu.memory_space<vmem>>, %arg3: memref<1x128xf32, #tpu.memory_space<vmem>>, %arg4: memref<2x128xf32, #tpu.memory_space<vmem>>) attributes {dimension_semantics = [#tpu.dimension_semantics<arbitrary>], iteration_bounds = array<i64: 1>, scalar_prefetch = 0 : i64, scratch_operands = 0 : i64, tpu.core_type = #tpu.core_type<tc>, window_params = [{pipeline_mode = #tpu.pipeline_mode<synchronous>, transform_indices = @transform_0, window_bounds = array<i64: 2, 128>}, {pipeline_mode = #tpu.pipeline_mode<synchronous>, transform_indices = @transform_1, window_bounds = array<i64: 1, 128>}, {pipeline_mode = #tpu.pipeline_mode<synchronous>, transform_indices = @transform_2, window_bounds = array<i64: 1, 128>}, {pipeline_mode = #tpu.pipeline_mode<synchronous>, transform_indices = @transform_3, window_bounds = array<i64: 2, 128>}]} {
    %c0 = arith.constant 0 : index
    %c0_0 = arith.constant 0 : index
    %0 = vector.load %arg1[%c0, %c0_0] : memref<2x128xf32, #tpu.memory_space<vmem>>, vector<2x128xf32>
    %c0_1 = arith.constant 0 : index
    %c0_2 = arith.constant 0 : index
    %1 = vector.load %arg2[%c0_1, %c0_2] : memref<1x128xf32, #tpu.memory_space<vmem>>, vector<1x128xf32>
    %c0_3 = arith.constant 0 : index
    %c0_4 = arith.constant 0 : index
    %2 = vector.load %arg3[%c0_3, %c0_4] : memref<1x128xf32, #tpu.memory_space<vmem>>, vector<1x128xf32>
    %cst = arith.constant dense<0.000000e+00> : vector<2xf32>
    %3 = vector.multi_reduction <add>, %0, %cst [1] : vector<2x128xf32> to vector<2xf32>
    %4 = vector.shape_cast %3 : vector<2xf32> to vector<2x1xf32>
    %cst_5 = arith.constant 1.280000e+02 : f32
    %5 = vector.broadcast %cst_5 : f32 to vector<2x1xf32>
    %6 = arith.divf %4, %5 : vector<2x1xf32>
    %7 = vector.broadcast %6 : vector<2x1xf32> to vector<2x128xf32>
    %8 = arith.subf %0, %7 : vector<2x128xf32>
    %9 = arith.mulf %8, %8 : vector<2x128xf32>
    %cst_6 = arith.constant dense<0.000000e+00> : vector<2xf32>
    %10 = vector.multi_reduction <add>, %9, %cst_6 [1] : vector<2x128xf32> to vector<2xf32>
    %11 = vector.shape_cast %10 : vector<2xf32> to vector<2x1xf32>
    %cst_7 = arith.constant 1.280000e+02 : f32
    %12 = vector.broadcast %cst_7 : f32 to vector<2x1xf32>
    %13 = arith.divf %11, %12 : vector<2x1xf32>
    %cst_8 = arith.constant 9.99999974E-6 : f32
    %14 = vector.broadcast %cst_8 : f32 to vector<2x1xf32>
    %15 = arith.addf %13, %14 : vector<2x1xf32>
    %16 = math.rsqrt %15 : vector<2x1xf32>
    %17 = vector.broadcast %16 : vector<2x1xf32> to vector<2x128xf32>
    %18 = arith.mulf %8, %17 : vector<2x128xf32>
    %19 = vector.broadcast %1 : vector<1x128xf32> to vector<2x128xf32>
    %20 = arith.mulf %18, %19 : vector<2x128xf32>
    %21 = vector.broadcast %2 : vector<1x128xf32> to vector<2x128xf32>
    %22 = arith.addf %20, %21 : vector<2x128xf32>
    %c0_9 = arith.constant 0 : index
    %c0_10 = arith.constant 0 : index
    %23 = vector.load %arg4[%c0_9, %c0_10] : memref<2x128xf32, #tpu.memory_space<vmem>>, vector<2x128xf32>
    tpu.vector_store %arg4[%c0_9, %c0_10], %22 {strides = array<i32>} : memref<2x128xf32, #tpu.memory_space<vmem>>, vector<2x128xf32>,
    return
  }
  func.func @transform_0(%arg0: i32) -> (i32, i32) {
    %c0_i32 = arith.constant 0 : i32
    %c0_i32_0 = arith.constant 0 : i32
    %c0_i32_1 = arith.constant 0 : i32
    return %c0_i32, %c0_i32_0 : i32, i32
  }
  func.func @transform_1(%arg0: i32) -> (i32, i32) {
    %c0_i32 = arith.constant 0 : i32
    %c0_i32_0 = arith.constant 0 : i32
    %c0_i32_1 = arith.constant 0 : i32
    return %c0_i32, %c0_i32_0 : i32, i32
  }
  func.func @transform_2(%arg0: i32) -> (i32, i32) {
    %c0_i32 = arith.constant 0 : i32
    %c0_i32_0 = arith.constant 0 : i32
    %c0_i32_1 = arith.constant 0 : i32
    return %c0_i32, %c0_i32_0 : i32, i32
  }
  func.func @transform_3(%arg0: i32) -> (i32, i32) {
    %c0_i32 = arith.constant 0 : i32
    %c0_i32_0 = arith.constant 0 : i32
    %c0_i32_1 = arith.constant 0 : i32
    return %c0_i32, %c0_i32_0 : i32, i32
  }
}

</mosaic_0001>

<bundles_post_ra>
// kernel: plip_vision_forward.6
= control target key start
LH: loop header
LB: loop body
LE: loop exit
PB: predicated region body
PF: predicated region fallthrough
CT: control target
= control target key end

     0   :  { %s549_s21 = smov 0   ;;  %s669_s0 = inlined_call_operand.vmem [shape: f32[2,4,192], index: 0, kind: input, shape index: {}]   ;;  %s670_s1 = inlined_call_operand.vmem [shape: f32[192,128], index: 1, kind: input, shape index: {}]   ;;  %s671_s2 = inlined_call_operand.vmem [shape: f32[1,128], index: 2, kind: input, shape index: {}]   ;;  %s672_s3 = inlined_call_operand.vmem [shape: f32[5,128], index: 3, kind: input, shape index: {}]   ;;  %s673_s4 = inlined_call_operand.vmem [shape: f32[1,128], index: 4, kind: input, shape index: {}]   ;;  %s674_s5 = inlined_call_operand.vmem [shape: f32[1,128], index: 5, kind: input, shape index: {}]   ;;  %s675_s6 = inlined_call_operand.vmem [shape: f32[2,5,128], index: 6, kind: output, shape index: {}]  }
   0x1 LB: > { %s443_s22 = sadd.s32 4294967295, %s511_s21   ;;  %p447_p0 = scmp.ge.s32.totalorder %s511_s21, 1  ;;  %s511_s21 = sphi %s549_s21, %s16_s21  }
   0x2   : > { %p212_p1 = scmp.lt.s32.totalorder %s511_s21, 3 }
   0x4   : > { %p213_p2 = pnand %p447_p0, %p212_p1 }
   0x5   : > { %v251_v0 = vld [vmem:[%s670_s1] sm:$0xff] (!%p213_p2)  ;;  %v252_v1 = vld [vmem:[%s670_s1 + $0x8] sm:$0xff] (!%p213_p2)  ;;  %v253_v2 = vld [vmem:[%s670_s1 + $0x10] sm:$0xff] (!%p213_p2)  ;;  %p241_p3 = scmp.lt.s32.totalorder (!%p213_p2), %s443_s22, 1  ;;  %v513_v3 = vmov (!%p213_p2), 0.0|0.0   ;;  %vm277_vm0 = vcmask (!%p213_p2), 523264  }
   0x6   : > { %216 = sbr.rel (%p213_p2) target bundleno = 586 (0x24a), region = 44  ;;  %457 = vmatprep.subr.bf16.mxu0 (!%p213_p2), %v513_v3  ;;  %v458_v4 = vpack.c.bf16 (!%p213_p2), %v252_v1, %v251_v0  ;;  %v254_v5 = vld [vmem:[%s670_s1 + $0x18] sm:$0xff] (!%p213_p2)  ;;  %v255_v7 = vld [vmem:[%s670_s1 + $0x20] sm:$0xff] (!%p213_p2)  ;;  %v256_v8 = vld [vmem:[%s670_s1 + $0x28] sm:$0xff] (!%p213_p2)  ;;  %vm354_vm1 = vcmask (!%p213_p2), 1040384   ;;  %vm360_vm2 = vcmask (!%p213_p2), 1044480  }
   0x7   : > { %v461_v6 = vpack.c.bf16 (!%p213_p2), %v254_v5, %v253_v2  ;;  %v464_v9 = vpack.c.bf16 (!%p213_p2), %v256_v8, %v255_v7  ;;  %v257_v10 = vld [vmem:[%s670_s1 + $0x30] sm:$0xff] (!%p213_p2)  ;;  %v258_v11 = vld [vmem:[%s670_s1 + $0x38] sm:$0xff] (!%p213_p2)  ;;  %v259_v15 = vld [vmem:[%s670_s1 + $0x40] sm:$0xff] (!%p213_p2) }
   0x8   : > { %459 = vmatpush1.bf16.msra.mxu0 (!%p213_p2), %v458_v4  ;;  %v467_v14 = vpack.c.bf16 (!%p213_p2), %v258_v11, %v257_v10  ;;  %v260_v16 = vld [vmem:[%s670_s1 + $0x48] sm:$0xff] (!%p213_p2)  ;;  %v261_v18 = vld [vmem:[%s670_s1 + $0x50] sm:$0xff] (!%p213_p2)  ;;  %v262_v19 = vld [vmem:[%s670_s1 + $0x58] sm:$0xff] (!%p213_p2) }
   0x9   : > { %460 = vmatprep.subr.bf16.mxu0 (!%p213_p2), %v513_v3  ;;  %v470_v17 = vpack.c.bf16 (!%p213_p2), %v260_v16, %v259_v15  ;;  %v473_v20 = vpack.c.bf16 (!%p213_p2), %v262_v19, %v261_v18  ;;  %v263_v21 = vld [vmem:[%s670_s1 + $0x60] sm:$0xff] (!%p213_p2)  ;;  %v264_v22 = vld [vmem:[%s670_s1 + $0x68] sm:$0xff] (!%p213_p2)  ;;  %v265_v24 = vld [vmem:[%s670_s1 + $0x70] sm:$0xff] (!%p213_p2) }
   0xa   : > { %v476_v23 = vpack.c.bf16 (!%p213_p2), %v264_v22, %v263_v21  ;;  %v266_v25 = vld [vmem:[%s670_s1 + $0x78] sm:$0xff] (!%p213_p2)  ;;  %v267_v27 = vld [vmem:[%s670_s1 + $0x80] sm:$0xff] (!%p213_p2)  ;;  %v268_v28 = vld [vmem:[%s670_s1 + $0x88] sm:$0xff] (!%p213_p2) }
   0xb   : > { %v479_v26 = vpack.c.bf16 (!%p213_p2), %v266_v25, %v265_v24  ;;  %v482_v29 = vpack.c.bf16 (!%p213_p2), %v268_v28, %v267_v27  ;;  %v269_v30 = vld [vmem:[%s670_s1 + $0x90] sm:$0xff] (!%p213_p2)  ;;  %v270_v31 = vld [vmem:[%s670_s1 + $0x98] sm:$0xff] (!%p213_p2)  ;;  %v271_v33 = vld [vmem:[%s670_s1 + $0xa0] sm:$0xff] (!%p213_p2) }
   0xc   : > { %462 = vmatpush1.bf16.msra.mxu0 (!%p213_p2), %v461_v6  ;;  %v485_v32 = vpack.c.bf16 (!%p213_p2), %v270_v31, %v269_v30  ;;  %v272_v34 = vld [vmem:[%s670_s1 + $0xa8] sm:$0xff] (!%p213_p2)  ;;  %v273_v36 = vld [vmem:[%s670_s1 + $0xb0] sm:$0xff] (!%p213_p2)  ;;  %v274_v37 = vld [vmem:[%s670_s1 + $0xb8] sm:$0xff] (!%p213_p2) }
   0xd   : > { %s677_s22 = smov (!%p241_p3, %s443_s22), 1  ;;  %463 = vmatprep.subr.bf16.mxu0 %v513_v3  ;;  %v488_v35 = vpack.c.bf16 %v272_v34, %v271_v33  ;;  %v491_v38 = vpack.c.bf16 %v274_v37, %v273_v36  ;;  %v350_v40 = vld [vmem:[%s671_s2] sm:$0x1] }
   0xe   : > { %s456_s11 = sshll.u32 %s677_s22, 3  ;;  %v356_v43 = vld [vmem:[%s672_s3] sm:$0x1f] }
   0xf   : > { %s245_s14 = scalar_lea.vmem %s669_s0, %s456_s11  ;;  %v452_v56 = vld [vmem:[%s673_s4] ss:$0 sm:$0xff]  ;;  %s249_s19 = scalar_lea.vmem %s675_s6, %s456_s11 }
  0x10   : > { %v250_v12 = vld [vmem:[%s245_s14] sm:$0xff]  ;;  %465 = vmatpush1.bf16.msra.mxu0 %v464_v9 }
  0x11   : > { %v276_v13 = vcombine.high %v250_v12, %v250_v12  ;;  %466 = vmatprep.subr.bf16.mxu0 %v513_v3  ;;  %v453_v58 = vld [vmem:[%s674_s5] ss:$0 sm:$0xff] }
  0x13   : > { %451 = vmatprep.mubr.msk.f32.mxu0 %vm277_vm0, %v276_v13 }
  0x14   : > { %468 = vmatpush1.bf16.msra.mxu0 %v467_v14 }
  0x15   : > { %469 = vmatprep.subr.bf16.mxu0 %v513_v3 }
  0x18   : > { %471 = vmatpush1.bf16.msra.mxu0 %v470_v17 }
  0x19   : > { %472 = vmatprep.subr.bf16.mxu0 %v513_v3 }
  0x1c   : > { %474 = vmatpush1.bf16.msra.mxu0 %v473_v20 }
  0x1d   : > { %475 = vmatprep.subr.bf16.mxu0 %v513_v3 }
  0x20   : > { %477 = vmatpush1.bf16.msra.mxu0 %v476_v23 }
  0x21   : > { %478 = vmatprep.subr.bf16.mxu0 %v513_v3 }
  0x24   : > { %480 = vmatpush1.bf16.msra.mxu0 %v479_v26 }
  0x25   : > { %481 = vmatprep.subr.bf16.mxu0 %v513_v3 }
  0x28   : > { %483 = vmatpush1.bf16.msra.mxu0 %v482_v29 }
  0x29   : > { %484 = vmatprep.subr.bf16.mxu0 %v513_v3 }
  0x2c   : > { %486 = vmatpush1.bf16.msra.mxu0 %v485_v32 }
  0x2d   : > { %487 = vmatprep.subr.bf16.mxu0 %v513_v3 }
  0x30   : > { %489 = vmatpush1.bf16.msra.mxu0 %v488_v35 }
  0x31   : > { %490 = vmatprep.subr.bf16.mxu0 %v513_v3 }
  0x34   : > { %492 = vmatpush1.bf16.msra.mxu0 %v491_v38 }
  0x37   : > { %345 = vmatmul.mubr.f32.vlgmr.msra.gmra.mrb[0].mxu0 %v250_v12 }
 0x10a   : > { %v346_v39 = vpop.f32.mrb[0].mxu0 }
 0x10b   : > { %v352_v41 = vrot.slane %v346_v39, 7  ;;  %v348_v42 = vpop.f32.mrb[1].mxu0 }
 0x10d   : > { %v355_v44 = vsel %vm354_vm1, %v350_v40, %v352_v41 }
 0x10e   : > { %v357_v45 = vadd.f32 %v356_v43, %v355_v44 }
 0x110   : > { %v361_v46 = vsel %vm360_vm2, %v357_v45, 0.0 }
 0x111   : > { %362 = vadd.xlane.f32.xlu0 %v361_v46 }
 0x19e   : > { %v363_v47 = vpop.xlane.xlu0 %362 }
 0x19f   : > { %v365_v48 = vmul.f32 0.0078125, %v363_v47 }
 0x1a1   : > { %v366_v49 = vsub.f32 %v357_v45, %v365_v48 }
 0x1a3   : > { %v367_v50 = vmul.f32 %v366_v49, %v366_v49 }
 0x1a5   : > { %v368_v51 = vsel %vm360_vm2, %v367_v50, 0.0 }
 0x1a6   : > { %369 = vadd.xlane.f32.xlu0 %v368_v51 }
 0x233   : > { %v370_v52 = vpop.xlane.xlu0 %369 }
 0x234   : > { %v371_v53 = vmul.f32 0.0078125, %v370_v52 }
 0x236   : > { %v372_v54 = vadd.f32 1e-05, %v371_v53 }
 0x238   : > { %503 = vrsqrt.f32 %v372_v54 }
 0x242   : > { %v504_v55 = vpop.eup %503 }
 0x243   : > { %v374_v57 = vmul.f32 %v504_v55, %v366_v49 }
 0x245   : > { %v381_v59 = vmul.f32 %v452_v56, %v374_v57 }
 0x247   : > { %v388_v60 = vadd.f32 %v453_v58, %v381_v59 }
 0x249   : > { %389 = vst [vmem:[%s249_s19] sm:$0x1f] %v388_v60 }
 0x24a PF: > { %s16_s21 = sadd.s32 1, %s511_s21  }
 0x24b   : > { %p13_p4 = scmp.ge.s32.totalorder %s16_s21, 4  }
 0x24d   :  { %15 = sbr.rel (!%p13_p4) target bundleno = 1 (0x1), region = 74 }

// kernel: plip_vision_forward.8
= control target key start
LH: loop header
LB: loop body
LE: loop exit
PB: predicated region body
PF: predicated region fallthrough
CT: control target
= control target key end

     0   :  { %s782_s24 = smov 0   ;;  %s1017_s0 = inlined_call_operand.vmem [shape: f32[2,5,128], index: 0, kind: input, shape index: {}]   ;;  %s1018_s1 = inlined_call_operand.vmem [shape: f32[1,128], index: 1, kind: input, shape index: {}]   ;;  %s1019_s2 = inlined_call_operand.vmem [shape: f32[1,128], index: 2, kind: input, shape index: {}]   ;;  %s1020_s3 = inlined_call_operand.vmem [shape: f32[128,256], index: 3, kind: input, shape index: {}]   ;;  %s1021_s4 = inlined_call_operand.vmem [shape: f32[1,256], index: 4, kind: input, shape index: {}]   ;;  %s1022_s5 = inlined_call_operand.vmem [shape: f32[256,128], index: 5, kind: input, shape index: {}]   ;;  %s1023_s6 = inlined_call_operand.vmem [shape: f32[1,128], index: 6, kind: input, shape index: {}]   ;;  %s1024_s7 = inlined_call_operand.vmem [shape: f32[2,5,128], index: 7, kind: output, shape index: {}]  }
   0x1 LB: > { %s601_s25 = sadd.s32 4294967295, %s739_s24   ;;  %p605_p0 = scmp.ge.s32.totalorder %s739_s24, 1  ;;  %s739_s24 = sphi %s782_s24, %s17_s24  }
   0x2   : > { %p236_p1 = scmp.lt.s32.totalorder %s739_s24, 3 }
   0x4   : > { %p237_p2 = pnand %p605_p0, %p236_p1 }
   0x5   : > { %p266_p3 = scmp.lt.s32.totalorder (!%p237_p2), %s601_s25, 1  ;;  %vm277_vm0 = vcmask (!%p237_p2), 1044480   ;;  %v307_v2 = vld [vmem:[%s1020_s3 + $0x8] sm:$0xff] (!%p237_p2)  ;;  %v309_v3 = vld [vmem:[%s1020_s3 + $0x18] sm:$0xff] (!%p237_p2)  ;;  %v306_v4 = vld [vmem:[%s1020_s3] sm:$0xff] (!%p237_p2)  ;;  %v741_v44 = vmov (!%p237_p2), 0.0  }
   0x6   : > { %240 = sbr.rel (%p237_p2) target bundleno = 796 (0x31c), region = 48  ;;  %v650_v5 = vpack.c.bf16 (!%p237_p2), %v309_v3, %v307_v2  ;;  %v308_v6 = vld [vmem:[%s1020_s3 + $0x10] sm:$0xff] (!%p237_p2)  ;;  %v311_v7 = vld [vmem:[%s1020_s3 + $0x28] sm:$0xff] (!%p237_p2)  ;;  %v313_v8 = vld [vmem:[%s1020_s3 + $0x38] sm:$0xff] (!%p237_p2)  ;;  %414 = vmatprep.mubr.f32.mxu0 (!%p237_p2), %v741_v44 }
   0x7   : > { %v652_v9 = vpack.c.bf16 (!%p237_p2), %v308_v6, %v306_v4  ;;  %v654_v10 = vpack.c.bf16 (!%p237_p2), %v313_v8, %v311_v7  ;;  %v310_v11 = vld [vmem:[%s1020_s3 + $0x20] sm:$0xff] (!%p237_p2)  ;;  %v312_v12 = vld [vmem:[%s1020_s3 + $0x30] sm:$0xff] (!%p237_p2)  ;;  %v315_v13 = vld [vmem:[%s1020_s3 + $0x48] sm:$0xff] (!%p237_p2) }
   0x8   : > { %651 = vmatprep.subr.bf16.mxu0 (!%p237_p2), %v650_v5  ;;  %v317_v14 = vld [vmem:[%s1020_s3 + $0x58] sm:$0xff] (!%p237_p2)  ;;  %v656_v15 = vpack.c.bf16 (!%p237_p2), %v312_v12, %v310_v11  ;;  %v314_v17 = vld [vmem:[%s1020_s3 + $0x40] sm:$0xff] (!%p237_p2)  ;;  %v316_v18 = vld [vmem:[%s1020_s3 + $0x50] sm:$0xff] (!%p237_p2) }
   0x9   : > { %653 = vmatpush1.bf16.msra.mxu0 (!%p237_p2), %v652_v9  ;;  %v658_v16 = vpack.c.bf16 (!%p237_p2), %v317_v14, %v315_v13  ;;  %v660_v19 = vpack.c.bf16 (!%p237_p2), %v316_v18, %v314_v17  ;;  %v319_v25 = vld [vmem:[%s1020_s3 + $0x68] sm:$0xff] (!%p237_p2)  ;;  %v321_v26 = vld [vmem:[%s1020_s3 + $0x78] sm:$0xff] (!%p237_p2)  ;;  %v318_v28 = vld [vmem:[%s1020_s3 + $0x60] sm:$0xff] (!%p237_p2) }
   0xa   : > { %655 = vmatprep.subr.bf16.mxu0 (!%p237_p2), %v654_v10  ;;  %v662_v27 = vpack.c.bf16 (!%p237_p2), %v321_v26, %v319_v25  ;;  %v320_v29 = vld [vmem:[%s1020_s3 + $0x70] sm:$0xff] (!%p237_p2)  ;;  %v323_v31 = vld [vmem:[%s1020_s3 + $0x88] sm:$0xff] (!%p237_p2)  ;;  %v325_v32 = vld [vmem:[%s1020_s3 + $0x98] sm:$0xff] (!%p237_p2) }
   0xb   : > { %v664_v30 = vpack.c.bf16 (!%p237_p2), %v320_v29, %v318_v28  ;;  %v666_v33 = vpack.c.bf16 (!%p237_p2), %v325_v32, %v323_v31  ;;  %v322_v34 = vld [vmem:[%s1020_s3 + $0x80] sm:$0xff] (!%p237_p2)  ;;  %v324_v35 = vld [vmem:[%s1020_s3 + $0x90] sm:$0xff] (!%p237_p2)  ;;  %v327_v37 = vld [vmem:[%s1020_s3 + $0xa8] sm:$0xff] (!%p237_p2) }
   0xc   : > { %v668_v36 = vpack.c.bf16 (!%p237_p2), %v324_v35, %v322_v34  ;;  %v329_v38 = vld [vmem:[%s1020_s3 + $0xb8] sm:$0xff] (!%p237_p2)  ;;  %v326_v39 = vld [vmem:[%s1020_s3 + $0xa0] sm:$0xff] (!%p237_p2)  ;;  %v328_v41 = vld [vmem:[%s1020_s3 + $0xb0] sm:$0xff] (!%p237_p2) }
   0xd   : > { %s1026_s25 = smov (!%p266_p3, %s601_s25), 1  ;;  %657 = vmatpush1.bf16.msra.mxu0 %v656_v15  ;;  %v670_v40 = vpack.c.bf16 %v329_v38, %v327_v37  ;;  %v331_v42 = vld [vmem:[%s1020_s3 + $0xc8] sm:$0xff]  ;;  %v333_v43 = vld [vmem:[%s1020_s3 + $0xd8] sm:$0xff]  ;;  %v672_v45 = vpack.c.bf16 %v328_v41, %v326_v39  ;;  %v330_v47 = vld [vmem:[%s1020_s3 + $0xc0] sm:$0xff] }
   0xe   : > { %s606_s26 = sshll.u32 %s1026_s25, 3  ;;  %659 = vmatprep.subr.bf16.mxu0 %v658_v16  ;;  %v674_v46 = vpack.c.bf16 %v333_v43, %v331_v42  ;;  %v332_v48 = vld [vmem:[%s1020_s3 + $0xd0] sm:$0xff]  ;;  %v335_v49 = vld [vmem:[%s1020_s3 + $0xe8] sm:$0xff]  ;;  %v337_v50 = vld [vmem:[%s1020_s3 + $0xf8] sm:$0xff] }
   0xf   : > { %s269_s29 = scalar_lea.vmem %s1017_s0, %s606_s26  ;;  %v676_v51 = vpack.c.bf16 %v332_v48, %v330_v47  ;;  %v678_v52 = vpack.c.bf16 %v337_v50, %v335_v49  ;;  %v334_v53 = vld [vmem:[%s1020_s3 + $0xe0] sm:$0xff]  ;;  %v336_v54 = vld [vmem:[%s1020_s3 + $0xf0] sm:$0xff]  ;;  %v454_v3 = vld [vmem:[%s1022_s5 + $0x88] sm:$0xff]  ;;  %v340_v50 = vlaneseq  ;;  %s273_s28 = scalar_lea.vmem %s1024_s7, %s606_s26 }
  0x10   : > { %v798_v0 = vld [vmem:[%s269_s29] sm:$0x1f]  ;;  %v680_v55 = vpack.c.bf16 %v336_v54, %v334_v53  ;;  %v438_v6 = vld [vmem:[%s1022_s5 + $0x8] sm:$0xff]  ;;  %v455_v8 = vld [vmem:[%s1022_s5 + $0x90] sm:$0xff] }
  0x11   : > { %v278_v1 = vsel %vm277_vm0, %v798_v0, 0.0  ;;  %661 = vmatpush1.bf16.msra.mxu0 %v660_v19  ;;  %v608_v60 = vld [vmem:[%s1018_s1] ss:$0 sm:$0xff]  ;;  %v456_v9 = vld [vmem:[%s1022_s5 + $0x98] sm:$0xff]  ;;  %v439_v11 = vld [vmem:[%s1022_s5 + $0x10] sm:$0xff] }
  0x12   : > { %279 = vadd.xlane.f32.xlu0 %v278_v1  ;;  %663 = vmatprep.subr.bf16.mxu0 %v662_v27  ;;  %v609_v62 = vld [vmem:[%s1019_s2] ss:$0 sm:$0xff]  ;;  %v686_v10 = vpack.c.bf16 %v456_v9, %v455_v8  ;;  %v440_v12 = vld [vmem:[%s1022_s5 + $0x18] sm:$0xff]  ;;  %v458_v15 = vld [vmem:[%s1022_s5 + $0xa8] sm:$0xff] }
  0x13   : > { %v453_v2 = vld [vmem:[%s1022_s5 + $0x80] sm:$0xff]  ;;  %v688_v13 = vpack.c.bf16 %v440_v12, %v439_v11  ;;  %v442_v18 = vld [vmem:[%s1022_s5 + $0x28] sm:$0xff]  ;;  %v463_v32 = vld [vmem:[%s1022_s5 + $0xd0] sm:$0xff] }
  0x14   : > { %v682_v4 = vpack.c.bf16 %v454_v3, %v453_v2  ;;  %v437_v5 = vld [vmem:[%s1022_s5] sm:$0xff]  ;;  %v462_v27 = vld [vmem:[%s1022_s5 + $0xc8] sm:$0xff]  ;;  %v447_v35 = vld [vmem:[%s1022_s5 + $0x50] sm:$0xff] }
  0x15   : > { %665 = vmatpush1.bf16.msra.mxu0 %v664_v30  ;;  %v684_v7 = vpack.c.bf16 %v438_v6, %v437_v5  ;;  %v457_v14 = vld [vmem:[%s1022_s5 + $0xa0] sm:$0xff]  ;;  %v446_v30 = vld [vmem:[%s1022_s5 + $0x48] sm:$0xff]  ;;  %v467_v44 = vld [vmem:[%s1022_s5 + $0xf0] sm:$0xff] }
  0x16   : > { %667 = vmatprep.subr.bf16.mxu0 %v666_v33  ;;  %683 = vmatprep.subr.bf16.mxu1 %v682_v4  ;;  %v690_v16 = vpack.c.bf16 %v458_v15, %v457_v14  ;;  %v441_v17 = vld [vmem:[%s1022_s5 + $0x20] sm:$0xff]  ;;  %v464_v33 = vld [vmem:[%s1022_s5 + $0xd8] sm:$0xff]  ;;  %v466_v39 = vld [vmem:[%s1022_s5 + $0xe8] sm:$0xff] }
  0x17   : > { %685 = vmatpush3.bf16.msra.mxu1 %v684_v7  ;;  %v692_v19 = vpack.c.bf16 %v442_v18, %v441_v17  ;;  %v461_v26 = vld [vmem:[%s1022_s5 + $0xc0] sm:$0xff]  ;;  %v702_v34 = vpack.c.bf16 %v464_v33, %v463_v32  ;;  %v450_v42 = vld [vmem:[%s1022_s5 + $0x68] sm:$0xff]  ;;  %v451_v47 = vld [vmem:[%s1022_s5 + $0x70] sm:$0xff] }
  0x18   : > { %687 = vmatprep.subr.bf16.mxu1 %v686_v10  ;;  %v698_v28 = vpack.c.bf16 %v462_v27, %v461_v26  ;;  %v445_v29 = vld [vmem:[%s1022_s5 + $0x40] sm:$0xff]  ;;  %v452_v48 = vld [vmem:[%s1022_s5 + $0x78] sm:$0xff] }
  0x19   : > { %669 = vmatpush1.bf16.msra.mxu0 %v668_v36  ;;  %v700_v31 = vpack.c.bf16 %v446_v30, %v445_v29  ;;  %v448_v36 = vld [vmem:[%s1022_s5 + $0x58] sm:$0xff]  ;;  %v465_v38 = vld [vmem:[%s1022_s5 + $0xe0] sm:$0xff]  ;;  %v712_v49 = vpack.c.bf16 %v452_v48, %v451_v47 }
  0x1a   : > { %671 = vmatprep.subr.bf16.mxu0 %v670_v40  ;;  %v704_v37 = vpack.c.bf16 %v448_v36, %v447_v35  ;;  %v706_v40 = vpack.c.bf16 %v466_v39, %v465_v38  ;;  %v449_v41 = vld [vmem:[%s1022_s5 + $0x60] sm:$0xff] }
  0x1b   : > { %689 = vmatpush3.bf16.msra.mxu1 %v688_v13  ;;  %v708_v43 = vpack.c.bf16 %v450_v42, %v449_v41  ;;  %v338_v53 = vld [vmem:[%s1021_s4] sm:$0x3] }
  0x1c   : > { %691 = vmatprep.subr.bf16.mxu1 %v690_v16  ;;  %v612_v11 = vld [vmem:[%s1023_s6] ss:$0 sm:$0xff] }
  0x1d   : > { %673 = vmatpush1.bf16.msra.mxu0 %v672_v45  ;;  %v468_v45 = vld [vmem:[%s1022_s5 + $0xf8] sm:$0xff] }
  0x1e   : > { %675 = vmatprep.subr.bf16.mxu0 %v674_v46  ;;  %v710_v46 = vpack.c.bf16 %v468_v45, %v467_v44 }
  0x1f   : > { %693 = vmatpush3.bf16.msra.mxu1 %v692_v19 }
  0x21   : > { %677 = vmatpush1.bf16.msra.mxu0 %v676_v51  ;;  %v341_v51 = vshrl.u32 %v340_v50, 7 }
  0x22   : > { %679 = vmatprep.subr.bf16.mxu0 %v678_v52 }
  0x23   : > { %v342_v52 = vsub.s32 0, %v341_v51  ;;  %v346_v54 = vsub.s32 1, %v341_v51 }
  0x25   : > { %681 = vmatpush1.bf16.msra.mxu0 %v680_v55  ;;  %v343_v55 = vrot.slane %v338_v53, %v342_v52 }
  0x9f   : > { %v280_v20 = vpop.xlane.xlu0 %279 }
  0xa0   : > { %v282_v21 = vmul.f32 0.0078125, %v280_v20  ;;  %v459_v20 = vld [vmem:[%s1022_s5 + $0xb0] sm:$0xff] }
  0xa2   : > { %v283_v22 = vsub.f32 %v798_v0, %v282_v21  ;;  %v460_v21 = vld [vmem:[%s1022_s5 + $0xb8] sm:$0xff] }
  0xa4   : > { %v284_v23 = vmul.f32 %v283_v22, %v283_v22 }
  0xa6   : > { %v285_v24 = vsel %vm277_vm0, %v284_v23, 0.0  ;;  %v443_v23 = vld [vmem:[%s1022_s5 + $0x30] sm:$0xff] }
  0xa7   : > { %286 = vadd.xlane.f32.xlu0 %v285_v24  ;;  %v444_v24 = vld [vmem:[%s1022_s5 + $0x38] sm:$0xff] }
  0xa8   : > { %v696_v25 = vpack.c.bf16 %v444_v24, %v443_v23 }
 0x134   : > { %v287_v56 = vpop.xlane.xlu0 %286 }
 0x135   : > { %v288_v57 = vmul.f32 0.0078125, %v287_v56  ;;  %v347_v56 = vrot.slane %v338_v53, %v346_v54 }
 0x137   : > { %v289_v58 = vadd.f32 1e-05, %v288_v57 }
 0x139   : > { %723 = vrsqrt.f32 %v289_v58 }
 0x143   : > { %v724_v59 = vpop.eup %723 }
 0x144   : > { %v291_v61 = vmul.f32 %v724_v59, %v283_v22  ;;  %v694_v22 = vpack.c.bf16 %v460_v21, %v459_v20 }
 0x146   : > { %v298_v63 = vmul.f32 %v608_v60, %v291_v61  ;;  %695 = vmatprep.subr.bf16.mxu1 %v694_v22 }
 0x147   : > { %697 = vmatpush3.bf16.msra.mxu1 %v696_v25 }
 0x148   : > { %v305_v1 = vadd.f32 %v609_v62, %v298_v63  ;;  %699 = vmatprep.subr.bf16.mxu1 %v698_v28 }
 0x14a   : > { %415 = vmatmul.mubr.f32.vlgmr.msra.gmra.mrb[0].mxu0 %v305_v1 }
 0x14b   : > { %701 = vmatpush3.bf16.msra.mxu1 %v700_v31 }
 0x14c   : > { %703 = vmatprep.subr.bf16.mxu1 %v702_v34 }
 0x14f   : > { %705 = vmatpush3.bf16.msra.mxu1 %v704_v37 }
 0x150   : > { %707 = vmatprep.subr.bf16.mxu1 %v706_v40 }
 0x153   : > { %709 = vmatpush3.bf16.msra.mxu1 %v708_v43 }
 0x154   : > { %711 = vmatprep.subr.bf16.mxu1 %v710_v46 }
 0x157   : > { %713 = vmatpush3.bf16.msra.mxu1 %v712_v49 }
 0x21d   : > { %v416_v57 = vpop.f32.mrb[0].mxu0 }
 0x21e   : > { %v417_v58 = vadd.f32 %v416_v57, %v343_v55  ;;  %v418_v59 = vpop.f32.mrb[1].mxu0 }
 0x21f   : > { %v419_v60 = vadd.f32 %v418_v59, %v347_v56 }
 0x220   : > { %v610_v61 = vmul.f32 -1.702, %v417_v58 }
 0x221   : > { %v611_v62 = vmul.f32 -1.702, %v419_v60 }
 0x222   : > { %v425_v63 = vmul.f32 1.442695, %v610_v61 }
 0x223   : > { %v427_v1 = vmul.f32 1.442695, %v611_v62 }
 0x224   : > { %725 = vpow2.f32 %v425_v63 }
 0x225   : > { %727 = vpow2.f32 %v427_v1 }
 0x22e   : > { %v726_v2 = vpop.eup %725 }
 0x22f   : > { %v728_v3 = vpop.eup %727  ;;  %v429_v4 = vadd.f32 1.0, %v726_v2 }
 0x230   : > { %v430_v5 = vadd.f32 1.0, %v728_v3 }
 0x231   : > { %729 = vrcp.f32 %v429_v4 }
 0x232   : > { %731 = vrcp.f32 %v430_v5 }
 0x23b   : > { %v730_v6 = vpop.eup %729 }
 0x23c   : > { %v732_v7 = vpop.eup %731  ;;  %v435_v9 = vmul.f32 %v730_v6, %v417_v58 }
 0x23d   : > { %v436_v8 = vmul.f32 %v732_v7, %v419_v60 }
 0x23f   : > { %540 = vmatprep.mubr.f32.mxu1 %v436_v8 }
 0x240   : > { %541 = vmatmul.mubr.f32.vlgmr.msra.gmra.mrb[0].mxu1 %v435_v9 }
 0x313   : > { %v647_v10 = vpop.f32.mrb[0].mxu1 }
 0x314   : > { %v648_v12 = vpop.f32.mrb[1].mxu1 }
 0x315   : > { %v649_v13 = vadd.f32 %v648_v12, %v647_v10 }
 0x317   : > { %v543_v14 = vadd.f32 %v649_v13, %v612_v11 }
 0x319   : > { %v546_v15 = vadd.f32 %v543_v14, %v798_v0 }
 0x31b   : > { %547 = vst [vmem:[%s273_s28] sm:$0x1f] %v546_v15 }
 0x31c PF: > { %s17_s24 = sadd.s32 1, %s739_s24  }
 0x31d   : > { %p14_p4 = scmp.ge.s32.totalorder %s17_s24, 4  }
 0x31f   :  { %16 = sbr.rel (!%p14_p4) target bundleno = 1 (0x1), region = 78 }

// kernel: plip_vision_forward.11
= control target key start
LH: loop header
LB: loop body
LE: loop exit
PB: predicated region body
PF: predicated region fallthrough
CT: control target
= control target key end

     0   :  { %vm18_vm0 = vcmask 1041408   ;;  %s133_s0 = inlined_call_operand.vmem [shape: f32[2,128], index: 0, kind: input, shape index: {}]   ;;  %s134_s1 = inlined_call_operand.vmem [shape: f32[1,128], index: 1, kind: input, shape index: {}]   ;;  %s135_s2 = inlined_call_operand.vmem [shape: f32[1,128], index: 2, kind: input, shape index: {}]   ;;  %s136_s3 = inlined_call_operand.hbm [shape: f32[2,128], index: 3, kind: output, shape index: {}]  }
   0x1   :  { %v15_v0 = vld [vmem:[%s133_s0] sm:$0x3] }
   0x2   :  { %8 = vsyncpa [#allocation3], 0  ;;  %v19_v1 = vsel %vm18_vm0, %v15_v0, 0.0  ;;  %v62_v11 = vld [vmem:[%s134_s1] ss:$0 sm:$0xff]  ;;  %s91_s17 = smov [#allocation2]  }
   0x3   :  { %20 = vadd.xlane.f32.xlu0 %v19_v1  ;;  %v63_v13 = vld [vmem:[%s135_s2] ss:$0 sm:$0xff]  ;;  %s54_s18 = sshll.u32 %s91_s17, 4  ;;  %s55_s18 = int_to_ptr.vmem [resolvable:$true] %s54_s18 }
   0x4   :  { %s67_s19 = scalar_lea.vmem %s55_s18, 32  ;;  %p72_p1 = scmp.lt.s32.totalorder %s55_s18, %s55_s18 }
   0x5   :  { %p68_p0 = scmp.ne.s32.totalorder %s55_s18, %s67_s19  ;;  %p73_p2 = scmp.lt.s32.totalorder %s67_s19, %s67_s19 }
   0x7   :  { %p74_p3 = por %p73_p2, %p72_p1 }
   0x9   :  { %p75_p4 = pnand %p74_p3, %p68_p0 }
  0x90   :  { %v21_v2 = vpop.xlane.xlu0 %20 }
  0x91   :  { %v23_v3 = vmul.f32 0.0078125, %v21_v2 }
  0x93   :  { %v24_v4 = vsub.f32 %v15_v0, %v23_v3 }
  0x95   :  { %v25_v5 = vmul.f32 %v24_v4, %v24_v4 }
  0x97   :  { %v26_v6 = vsel %vm18_vm0, %v25_v5, 0.0 }
  0x98   :  { %27 = vadd.xlane.f32.xlu0 %v26_v6 }
 0x125   :  { %v28_v7 = vpop.xlane.xlu0 %27 }
 0x126   :  { %v29_v8 = vmul.f32 0.0078125, %v28_v7 }
 0x128   :  { %v30_v9 = vadd.f32 1e-05, %v29_v8 }
 0x12a   :  { %65 = vrsqrt.f32 %v30_v9 }
 0x134   :  { %v66_v10 = vpop.eup %65 }
 0x135   :  { %v32_v12 = vmul.f32 %v66_v10, %v24_v4 }
 0x137   :  { %v39_v14 = vmul.f32 %v62_v11, %v32_v12 }
 0x139   :  { %v46_v15 = vadd.f32 %v63_v13, %v39_v14 }
 0x13b   :  { %47 = vst [vmem:[#allocation2] sm:$0x3] %v46_v15 }
 0x13c   :  { %78 = shalt.err (!%p75_p4)
}
 0x13d   :  { %s79_s21 = scalar_lea.hbm %s136_s3, 32 }
 0x13e   :  { %p80_p5 = scmp.ne.s32.totalorder %s136_s3, %s79_s21  ;;  %p83_p6 = scmp.lt.u32.totalorder %s79_s21, %s136_s3 }
 0x140   :  { %p85_p7 = pnand %p83_p6, %p80_p5 }
 0x142   :  { %88 = shalt.err (!%p85_p7)
}
 0x143   :  { %57 = dma.vmem_to_hbm [thread:$0]  %s55_s18, 32, %s136_s3, [#allocation3]  }
 0x144   :  { %89 = dma.done.wait [#allocation3], 32  }
 0x145   :  { %90 = vsyncadd [#allocation3], 4294967264 }
 0x146   :  { %61 = vsyncpa [#allocation3], 1 }

// kernel: plip_vision_forward.7
= control target key start
LH: loop header
LB: loop body
LE: loop exit
PB: predicated region body
PF: predicated region fallthrough
CT: control target
= control target key end

     0   :  { %s1695_s24 = smov 0   ;;  %s2036_s0 = inlined_call_operand.vmem [shape: f32[2,5,128], index: 0, kind: input, shape index: {}]   ;;  %s2037_s1 = inlined_call_operand.vmem [shape: f32[1,128], index: 1, kind: input, shape index: {}]   ;;  %s2038_s2 = inlined_call_operand.vmem [shape: f32[1,128], index: 2, kind: input, shape index: {}]   ;;  %s2039_s3 = inlined_call_operand.vmem [shape: f32[128,384], index: 3, kind: input, shape index: {}]   ;;  %s2040_s4 = inlined_call_operand.vmem [shape: f32[1,384], index: 4, kind: input, shape index: {}]   ;;  %s2041_s5 = inlined_call_operand.vmem [shape: f32[128,128], index: 5, kind: input, shape index: {}]   ;;  %s2042_s6 = inlined_call_operand.vmem [shape: f32[1,128], index: 6, kind: input, shape index: {}]   ;;  %s2043_s7 = inlined_call_operand.vmem [shape: f32[2,5,128], index: 7, kind: output, shape index: {}]  }
   0x1 LB: > { %s1341_s25 = sadd.s32 4294967295, %s1647_s24   ;;  %p1345_p0 = scmp.ge.s32.totalorder %s1647_s24, 1  ;;  %s1647_s24 = sphi %s1695_s24, %s17_s24  }
   0x2   : > { %p236_p1 = scmp.lt.s32.totalorder %s1647_s24, 3 }
   0x4   : > { %p237_p2 = pnand %p1345_p0, %p236_p1 }
   0x5   : > { %p266_p3 = scmp.lt.s32.totalorder (!%p237_p2), %s1341_s25, 1  ;;  %vm277_vm0 = vcmask (!%p237_p2), 1044480   ;;  %v307_v2 = vld [vmem:[%s2039_s3 + $0x8] sm:$0xff] (!%p237_p2)  ;;  %v310_v3 = vld [vmem:[%s2039_s3 + $0x20] sm:$0xff] (!%p237_p2)  ;;  %v1649_v6 = vmov (!%p237_p2), 0.0|0.0   ;;  %v309_v7 = vld [vmem:[%s2039_s3 + $0x18] sm:$0xff] (!%p237_p2) }
   0x6   : > { %240 = sbr.rel (%p237_p2) target bundleno = 2587 (0xa1b), region = 48  ;;  %v306_v4 = vld [vmem:[%s2039_s3] sm:$0xff] (!%p237_p2)  ;;  %v1529_v5 = vpack.c.bf16 (!%p237_p2), %v310_v3, %v307_v2  ;;  %1561 = vmatprep.subr.bf16.mxu1 (!%p237_p2), %v1649_v6  ;;  %v308_v8 = vld [vmem:[%s2039_s3 + $0x10] sm:$0xff] (!%p237_p2)  ;;  %v311_v9 = vld [vmem:[%s2039_s3 + $0x28] sm:$0xff] (!%p237_p2)  ;;  %v1650_v59 = vmov (!%p237_p2), 0.0   ;;  %vm1651_vm1 = vmmov (!%p237_p2), 0  }
   0x7   : > { %v1531_v10 = vpack.c.bf16 (!%p237_p2), %v309_v7, %v306_v4  ;;  %v1562_v11 = vpack.c.bf16 (!%p237_p2), %v311_v9, %v308_v8  ;;  %v313_v12 = vld [vmem:[%s2039_s3 + $0x38] sm:$0xff] (!%p237_p2)  ;;  %v316_v13 = vld [vmem:[%s2039_s3 + $0x50] sm:$0xff] (!%p237_p2)  ;;  %v315_v16 = vld [vmem:[%s2039_s3 + $0x48] sm:$0xff] (!%p237_p2)  ;;  %435 = vmatprep.mubr.f32.mxu0 (!%p237_p2), %v1650_v59  ;;  %1451 = vmatprep.mubr.msk.f32.mxu1 (!%p237_p2), %vm1651_vm1, %v1650_v59  ;;  %vm512_vm2 = vcmask (!%p237_p2), 261120   ;;  %s1652_s9 = smov (!%p237_p2), 96   ;;  %s1653_s10 = smov (!%p237_p2), 64  }
   0x8   : > { %v312_v14 = vld [vmem:[%s2039_s3 + $0x30] sm:$0xff] (!%p237_p2)  ;;  %1530 = vmatprep.subr.bf16.mxu0 (!%p237_p2), %v1529_v5  ;;  %v1533_v15 = vpack.c.bf16 (!%p237_p2), %v316_v13, %v313_v12  ;;  %v314_v17 = vld [vmem:[%s2039_s3 + $0x40] sm:$0xff] (!%p237_p2)  ;;  %v317_v18 = vld [vmem:[%s2039_s3 + $0x58] sm:$0xff] (!%p237_p2)  ;;  %vm589_vm3 = vcmask (!%p237_p2), 36864   ;;  %vm599_vm4 = vcmask (!%p237_p2), 39936   ;;  %s1654_s11 = smov (!%p237_p2), 32  }
   0x9   : > { %1532 = vmatpush1.bf16.msra.mxu0 (!%p237_p2), %v1531_v10  ;;  %1563 = vmatpush3.bf16.msra.mxu1 (!%p237_p2), %v1562_v11  ;;  %v1535_v19 = vpack.c.bf16 (!%p237_p2), %v315_v16, %v312_v14  ;;  %v1565_v20 = vpack.c.bf16 (!%p237_p2), %v317_v18, %v314_v17  ;;  %v319_v21 = vld [vmem:[%s2039_s3 + $0x68] sm:$0xff] (!%p237_p2)  ;;  %v322_v22 = vld [vmem:[%s2039_s3 + $0x80] sm:$0xff] (!%p237_p2)  ;;  %v321_v25 = vld [vmem:[%s2039_s3 + $0x78] sm:$0xff] (!%p237_p2)  ;;  %vm1189_vm5 = vcmask (!%p237_p2), 523264   ;;  %vm1191_vm6 = vcmask (!%p237_p2), 785408  }
   0xa   : > { %v318_v23 = vld [vmem:[%s2039_s3 + $0x60] sm:$0xff] (!%p237_p2)  ;;  %1534 = vmatprep.subr.bf16.mxu0 (!%p237_p2), %v1533_v15  ;;  %1564 = vmatprep.subr.bf16.mxu1 (!%p237_p2), %v1649_v6  ;;  %v1537_v24 = vpack.c.bf16 (!%p237_p2), %v322_v22, %v319_v21  ;;  %v320_v26 = vld [vmem:[%s2039_s3 + $0x70] sm:$0xff] (!%p237_p2)  ;;  %v323_v27 = vld [vmem:[%s2039_s3 + $0x88] sm:$0xff] (!%p237_p2) }
   0xb   : > { %v1539_v28 = vpack.c.bf16 (!%p237_p2), %v321_v25, %v318_v23  ;;  %v1568_v29 = vpack.c.bf16 (!%p237_p2), %v323_v27, %v320_v26  ;;  %v325_v35 = vld [vmem:[%s2039_s3 + $0x98] sm:$0xff] (!%p237_p2)  ;;  %v328_v36 = vld [vmem:[%s2039_s3 + $0xb0] sm:$0xff] (!%p237_p2)  ;;  %v327_v39 = vld [vmem:[%s2039_s3 + $0xa8] sm:$0xff] (!%p237_p2) }
   0xc   : > { %v1541_v37 = vpack.c.bf16 (!%p237_p2), %v328_v36, %v325_v35  ;;  %v324_v38 = vld [vmem:[%s2039_s3 + $0x90] sm:$0xff] (!%p237_p2)  ;;  %v326_v40 = vld [vmem:[%s2039_s3 + $0xa0] sm:$0xff] (!%p237_p2)  ;;  %v329_v42 = vld [vmem:[%s2039_s3 + $0xb8] sm:$0xff] (!%p237_p2) }
   0xd   : > { %s2045_s25 = smov (!%p266_p3, %s1341_s25), 1  ;;  %1536 = vmatpush1.bf16.msra.mxu0 %v1535_v19  ;;  %1566 = vmatpush3.bf16.msra.mxu1 %v1565_v20  ;;  %v1543_v41 = vpack.c.bf16 %v327_v39, %v324_v38  ;;  %v1571_v43 = vpack.c.bf16 %v329_v42, %v326_v40  ;;  %v331_v44 = vld [vmem:[%s2039_s3 + $0xc8] sm:$0xff]  ;;  %v334_v45 = vld [vmem:[%s2039_s3 + $0xe0] sm:$0xff]  ;;  %v333_v48 = vld [vmem:[%s2039_s3 + $0xd8] sm:$0xff] }
   0xe   : > { %s1346_s26 = sshll.u32 %s2045_s25, 3  ;;  %1538 = vmatprep.subr.bf16.mxu0 %v1537_v24  ;;  %1567 = vmatprep.subr.bf16.mxu1 %v1649_v6  ;;  %v1545_v46 = vpack.c.bf16 %v334_v45, %v331_v44  ;;  %v330_v47 = vld [vmem:[%s2039_s3 + $0xc0] sm:$0xff]  ;;  %v332_v49 = vld [vmem:[%s2039_s3 + $0xd0] sm:$0xff]  ;;  %v335_v51 = vld [vmem:[%s2039_s3 + $0xe8] sm:$0xff] }
   0xf   : > { %s269_s29 = scalar_lea.vmem %s2036_s0, %s1346_s26  ;;  %v1547_v50 = vpack.c.bf16 %v333_v48, %v330_v47  ;;  %v337_v52 = vld [vmem:[%s2039_s3 + $0xf8] sm:$0xff]  ;;  %v340_v53 = vld [vmem:[%s2039_s3 + $0x110] sm:$0xff]  ;;  %v1574_v54 = vpack.c.bf16 %v335_v51, %v332_v49  ;;  %v339_v57 = vld [vmem:[%s2039_s3 + $0x108] sm:$0xff]  ;;  %s273_s8 = scalar_lea.vmem %s2043_s7, %s1346_s26 }
  0x10   : > { %v1711_v0 = vld [vmem:[%s269_s29] sm:$0x1f]  ;;  %v1549_v55 = vpack.c.bf16 %v340_v53, %v337_v52  ;;  %v336_v56 = vld [vmem:[%s2039_s3 + $0xf0] sm:$0xff]  ;;  %v341_v61 = vld [vmem:[%s2039_s3 + $0x118] sm:$0xff] }
  0x11   : > { %v278_v1 = vsel %vm277_vm0, %v1711_v0, 0.0  ;;  %1540 = vmatpush1.bf16.msra.mxu0 %v1539_v28  ;;  %1569 = vmatpush3.bf16.msra.mxu1 %v1568_v29  ;;  %v338_v58 = vld [vmem:[%s2039_s3 + $0x100] sm:$0xff]  ;;  %v1551_v60 = vpack.c.bf16 %v339_v57, %v336_v56  ;;  %v343_v62 = vld [vmem:[%s2039_s3 + $0x128] sm:$0xff]  ;;  %v345_v4 = vld [vmem:[%s2039_s3 + $0x138] sm:$0xff]  ;;  %v356_v28 = vlaneseq }
  0x12   : > { %279 = vadd.xlane.f32.xlu0 %v278_v1  ;;  %1570 = vmatprep.subr.bf16.mxu1 %v1649_v6  ;;  %v346_v63 = vld [vmem:[%s2039_s3 + $0x140] sm:$0xff]  ;;  %v1577_v1 = vpack.c.bf16 %v341_v61, %v338_v58  ;;  %v344_v5 = vld [vmem:[%s2039_s3 + $0x130] sm:$0xff]  ;;  %v347_v7 = vld [vmem:[%s2039_s3 + $0x148] sm:$0xff] }
  0x13   : > { %1542 = vmatprep.subr.bf16.mxu0 %v1541_v37  ;;  %v1553_v2 = vpack.c.bf16 %v346_v63, %v343_v62  ;;  %v342_v3 = vld [vmem:[%s2039_s3 + $0x120] sm:$0xff]  ;;  %v349_v8 = vld [vmem:[%s2039_s3 + $0x158] sm:$0xff]  ;;  %v352_v9 = vld [vmem:[%s2039_s3 + $0x170] sm:$0xff]  ;;  %v1580_v11 = vpack.c.bf16 %v347_v7, %v344_v5  ;;  %v357_v29 = vshrl.u32 %v356_v28, 7 }
  0x14   : > { %v1555_v10 = vpack.c.bf16 %v345_v4, %v342_v3  ;;  %v1557_v12 = vpack.c.bf16 %v352_v9, %v349_v8  ;;  %v348_v13 = vld [vmem:[%s2039_s3 + $0x150] sm:$0xff]  ;;  %v351_v14 = vld [vmem:[%s2039_s3 + $0x168] sm:$0xff]  ;;  %v350_v15 = vld [vmem:[%s2039_s3 + $0x160] sm:$0xff] }
  0x15   : > { %1544 = vmatpush1.bf16.msra.mxu0 %v1543_v41  ;;  %1572 = vmatpush3.bf16.msra.mxu1 %v1571_v43  ;;  %v353_v16 = vld [vmem:[%s2039_s3 + $0x178] sm:$0xff]  ;;  %v1559_v17 = vpack.c.bf16 %v351_v14, %v348_v13  ;;  %v1348_v23 = vld [vmem:[%s2037_s1] ss:$0 sm:$0xff] }
  0x16   : > { %1573 = vmatprep.subr.bf16.mxu1 %v1649_v6  ;;  %1546 = vmatprep.subr.bf16.mxu0 %v1545_v46  ;;  %v1583_v18 = vpack.c.bf16 %v353_v16, %v350_v15  ;;  %v1349_v25 = vld [vmem:[%s2038_s2] ss:$0 sm:$0xff] }
  0x19   : > { %1548 = vmatpush1.bf16.msra.mxu0 %v1547_v50  ;;  %1575 = vmatpush3.bf16.msra.mxu1 %v1574_v54 }
  0x1a   : > { %1550 = vmatprep.subr.bf16.mxu0 %v1549_v55  ;;  %1576 = vmatprep.subr.bf16.mxu1 %v1649_v6 }
  0x1d   : > { %1552 = vmatpush1.bf16.msra.mxu0 %v1551_v60  ;;  %1578 = vmatpush3.bf16.msra.mxu1 %v1577_v1 }
  0x1e   : > { %1554 = vmatprep.subr.bf16.mxu0 %v1553_v2  ;;  %1579 = vmatprep.subr.bf16.mxu1 %v1649_v6 }
  0x21   : > { %1556 = vmatpush1.bf16.msra.mxu0 %v1555_v10  ;;  %1581 = vmatpush3.bf16.msra.mxu1 %v1580_v11 }
  0x22   : > { %1558 = vmatprep.subr.bf16.mxu0 %v1557_v12  ;;  %1582 = vmatprep.subr.bf16.mxu1 %v1649_v6 }
  0x25   : > { %1560 = vmatpush1.bf16.msra.mxu0 %v1559_v17  ;;  %1584 = vmatpush3.bf16.msra.mxu1 %v1583_v18 }
  0x26   : > { %1585 = vmatprep.subr.bf16.mxu0 %v1649_v6  ;;  %1454 = vmatprep.subr.mxu1 %v1650_v59 }
  0x9f   : > { %v280_v30 = vpop.xlane.xlu0 %279 }
  0xa0   : > { %v282_v31 = vmul.f32 0.0078125, %v280_v30  ;;  %v358_v30 = vsub.s32 0, %v357_v29 }
  0xa2   : > { %v1774_v32 = vsub.f32 %v1711_v0, %v282_v31  ;;  %v354_v31 = vld [vmem:[%s2040_s4] sm:$0x7] }
  0xa4   : > { %v284_v33 = vmul.f32 %v1774_v32, %v1774_v32 }
  0xa6   : > { %v285_v34 = vsel %vm277_vm0, %v284_v33, 0.0  ;;  %v359_v33 = vrot.slane %v354_v31, %v358_v30 }
  0xa7   : > { %286 = vadd.xlane.f32.xlu0 %v285_v34  ;;  %v366_v34 = vsub.s32 2, %v357_v29 }
  0xa9   : > { %v367_v39 = vrot.slane %v354_v31, %v366_v34 }
 0x134   : > { %v287_v19 = vpop.xlane.xlu0 %286 }
 0x135   : > { %v288_v20 = vmul.f32 0.0078125, %v287_v19 }
 0x137   : > { %v289_v21 = vadd.f32 1e-05, %v288_v20 }
 0x139   : > { %1623 = vrsqrt.f32 %v289_v21 }
 0x143   : > { %v1624_v22 = vpop.eup %1623 }
 0x144   : > { %v291_v24 = vmul.f32 %v1624_v22, %v1774_v32  ;;  %v362_v32 = vsub.s32 1, %v357_v29 }
 0x146   : > { %v298_v26 = vmul.f32 %v1348_v23, %v291_v24  ;;  %v363_v35 = vrot.slane %v354_v31, %v362_v32 }
 0x148   : > { %v305_v27 = vadd.f32 %v1349_v25, %v298_v26 }
 0x14a   : > { %436 = vmatmul.mubr.f32.vlgmr.msra.gmra.mrb[0].mxu0 %v305_v27  ;;  %1452 = vmatmul.mubr.f32.vlgmr.msra.gmra.mrb[0].mxu1 %v305_v27 }
 0x14b   : > { %1456 = vmatprep.mubr.msk.f32.mxu1 %vm1651_vm1, %v1650_v59  ;;  %1526 = vmatprep.mubr.msk.f32.mxu0 %vm1651_vm1, %v1650_v59 }
 0x21d   : > { %v437_v36 = vpop.f32.mrb[0].mxu0  ;;  %v508_v37 = vpop.f32.mrb[0].mxu1 }
 0x21e   : > { %v438_v38 = vadd.f32 %v437_v36, %v359_v33  ;;  %v439_v40 = vpop.f32.mrb[1].mxu0  ;;  %v1453_v41 = vpop.f32.mrb[1].mxu1  ;;  %v1897_v43 = vadd.f32 %v508_v37, %v367_v39  ;;  %v1194_v36 = vld [vmem:[%s2041_s5 + $0x8] sm:$0xff]  ;;  %v1195_v37 = vld [vmem:[%s2041_s5 + $0x10] sm:$0xff]  ;;  %v1196_v39 = vld [vmem:[%s2041_s5 + $0x18] sm:$0xff] }
 0x21f   : > { %v1892_v42 = vadd.f32 %v439_v40, %v363_v35  ;;  %v1193_v35 = vld [vmem:[%s2041_s5] sm:$0xff]  ;;  %v1589_v40 = vpack.c.bf16 %v1196_v39, %v1195_v37 }
 0x220   : > { %678 = vrot.lane.b32.xlu0 %v438_v38, %s1652_s9  ;;  %v1197_v41 = vld [vmem:[%s2041_s5 + $0x20] sm:$0xff] }
 0x221   : > { %1455 = vmatpush3.xpose.msk.msra.mxu1 %vm512_vm2, %v1892_v42 }
 0x222   : > { %1459 = vmatprep.subr.mxu1 %v1650_v59 }
 0x224   : > { %765 = vrot.lane.b32.xlu0 %v1897_v43, %s1652_s9  ;;  %1457 = vmatmul.mubr.msk.f32.vlgmr.msra.gmra.mrb[2].mxu1 %vm512_vm2, %v438_v38 }
 0x225   : > { %1460 = vmatpush3.msk.msra.mxu1 %vm277_vm0, %v1897_v43  ;;  %1461 = vmatprep.mubr.msk.f32.mxu1 %vm1651_vm1, %v1650_v59 }
 0x226   : > { %1464 = vmatprep.subr.mxu1 %v1650_v59 }
 0x228   : > { %846 = vrot.lane.b32.xlu0 %v1892_v42, %s1653_s10 }
 0x22c   : > { %844 = vrot.lane.b32.xlu0 %v438_v38, %s1653_s10 }
 0x292   : > { %v679_v50 = vpop.permute.xlu0 %678 }
 0x296   : > { %v766_v53 = vpop.permute.xlu0 %765 }
 0x29a   : > { %v847_v63 = vpop.permute.xlu0 %846 }
 0x29e   : > { %v845_v2 = vpop.permute.xlu0 %844 }
 0x2f7   : > { %v585_v44 = vpop.f32.mrb[2].mxu1 }
 0x2f8   : > { %v1458_v45 = vpop.f32.mrb[3].mxu1  ;;  %v590_v46 = vsel %vm589_vm3, %v585_v44, -inf }
 0x2f9   : > { %591 = vmax.xlane.f32.xlu1 %v590_v46  ;;  %v1200_v45 = vld [vmem:[%s2041_s5 + $0x38] sm:$0xff] }
 0x30a   : > { %680 = vrot.lane.b32.xlu1 %v1892_v42, %s1652_s9 }
 0x386   : > { %v592_v47 = vpop.xlane.xlu1 %591 }
 0x387   : > { %v593_v48 = vsub.f32 %v585_v44, %v592_v47  ;;  %v1199_v44 = vld [vmem:[%s2041_s5 + $0x30] sm:$0xff]  ;;  %v1201_v47 = vld [vmem:[%s2041_s5 + $0x40] sm:$0xff] }
 0x388   : > { %v1595_v46 = vpack.c.bf16 %v1200_v45, %v1199_v44 }
 0x389   : > { %v594_v49 = vmul.f32 1.442695, %v593_v48  ;;  %v1202_v48 = vld [vmem:[%s2041_s5 + $0x48] sm:$0xff] }
 0x38a   : > { %v681_v52 = vpop.permute.xlu1 %680 }
 0x38b   : > { %1625 = vpow2.f32 %v594_v49  ;;  %v1598_v49 = vpack.c.bf16 %v1202_v48, %v1201_v47 }
 0x395   : > { %v1914_v51 = vpop.eup %1625 }
 0x396   : > { %1462 = vmatmul.mubr.msk.f32.vlgmr.msra.gmra.mrb[4].mxu1 %vm599_vm4, %v1914_v51  ;;  %v596_v32 = vsel %vm589_vm3, %v1914_v51, 0.0  ;;  %v1204_v51 = vld [vmem:[%s2041_s5 + $0x58] sm:$0xff] }
 0x397   : > { %1465 = vmatpush3.xpose.msk.msra.mxu1 %vm512_vm2, %v681_v52  ;;  %1466 = vmatprep.mubr.msk.f32.mxu1 %vm1651_vm1, %v1650_v59 }
 0x398   : > { %1469 = vmatprep.subr.mxu1 %v1650_v59 }
 0x39a   : > { %1467 = vmatmul.mubr.msk.f32.vlgmr.msra.gmra.mrb[6].mxu1 %vm512_vm2, %v679_v50  ;;  %v1203_v50 = vld [vmem:[%s2041_s5 + $0x50] sm:$0xff] }
 0x39b   : > { %1470 = vmatpush3.msk.msra.mxu1 %vm277_vm0, %v766_v53  ;;  %1471 = vmatprep.mubr.msk.f32.mxu1 %vm1651_vm1, %v1650_v59  ;;  %v1601_v52 = vpack.c.bf16 %v1204_v51, %v1203_v50  ;;  %v1205_v53 = vld [vmem:[%s2041_s5 + $0x60] sm:$0xff] }
 0x39c   : > { %1474 = vmatprep.subr.mxu1 %v1650_v59 }
 0x469   : > { %v1927_v54 = vpop.f32.mrb[4].mxu1 }
 0x46a   : > { %v1463_v55 = vpop.f32.mrb[5].mxu1 }
 0x46b   : > { %v1206_v55 = vld [vmem:[%s2041_s5 + $0x68] sm:$0xff] }
 0x46d   : > { %v752_v56 = vpop.f32.mrb[6].mxu1 }
 0x46e   : > { %v1468_v57 = vpop.f32.mrb[7].mxu1  ;;  %v756_v58 = vsel %vm589_vm3, %v752_v56, -inf }
 0x46f   : > { %757 = vmax.xlane.f32.xlu1 %v756_v58  ;;  %v1207_v57 = vld [vmem:[%s2041_s5 + $0x70] sm:$0xff]  ;;  %v1208_v58 = vld [vmem:[%s2041_s5 + $0x78] sm:$0xff] }
 0x480   : > { %931 = vrot.lane.b32.xlu1 %v1897_v43, %s1653_s10 }
 0x484   : > { %1010 = vrot.lane.b32.xlu1 %v438_v38, %s1654_s11  ;;  %v1586_v38 = vpack.c.bf16 %v1194_v36, %v1193_v35 }
 0x486   : > { %1587 = vmatpush3.bf16.msra.mxu0 %v1586_v38 }
 0x487   : > { %1588 = vmatprep.subr.bf16.mxu0 %v1649_v6 }
 0x48a   : > { %1590 = vmatpush3.bf16.msra.mxu0 %v1589_v40 }
 0x48b   : > { %1591 = vmatprep.subr.bf16.mxu0 %v1649_v6 }
 0x4fc   : > { %v758_v60 = vpop.xlane.xlu1 %757 }
 0x4fd   : > { %v759_v61 = vsub.f32 %v752_v56, %v758_v60  ;;  %v1604_v56 = vpack.c.bf16 %v1206_v55, %v1205_v53  ;;  %v1607_v60 = vpack.c.bf16 %v1208_v58, %v1207_v57 }
 0x4ff   : > { %v760_v62 = vmul.f32 1.442695, %v759_v61 }
 0x500   : > { %v932_v3 = vpop.permute.xlu1 %931 }
 0x501   : > { %1627 = vpow2.f32 %v760_v62 }
 0x504   : > { %v1011_v16 = vpop.permute.xlu1 %1010 }
 0x50b   : > { %v1628_v1 = vpop.eup %1627 }
 0x50c   : > { %1472 = vmatmul.mubr.msk.f32.vlgmr.msra.gmra.mrb[8].mxu1 %vm599_vm4, %v1628_v1  ;;  %v762_v10 = vsel %vm589_vm3, %v1628_v1, 0.0 }
 0x50d   : > { %1475 = vmatpush3.xpose.msk.msra.mxu1 %vm512_vm2, %v847_v63  ;;  %1476 = vmatprep.mubr.msk.f32.mxu1 %vm1651_vm1, %v1650_v59 }
 0x50e   : > { %1479 = vmatprep.subr.mxu1 %v1650_v59 }
 0x510   : > { %1477 = vmatmul.mubr.msk.f32.vlgmr.msra.gmra.mrb[10].mxu1 %vm512_vm2, %v845_v2 }
 0x511   : > { %1480 = vmatpush3.msk.msra.mxu1 %vm277_vm0, %v932_v3  ;;  %1481 = vmatprep.mubr.msk.f32.mxu1 %vm1651_vm1, %v1650_v59 }
 0x512   : > { %1484 = vmatprep.subr.mxu1 %v1650_v59 }
 0x5df   : > { %v838_v4 = vpop.f32.mrb[8].mxu1 }
 0x5e0   : > { %v1473_v5 = vpop.f32.mrb[9].mxu1 }
 0x5e3   : > { %v918_v7 = vpop.f32.mrb[10].mxu1 }
 0x5e4   : > { %v1478_v8 = vpop.f32.mrb[11].mxu1  ;;  %v922_v9 = vsel %vm589_vm3, %v918_v7, -inf }
 0x5e5   : > { %923 = vmax.xlane.f32.xlu0 %v922_v9 }
 0x5fb   : > { %1012 = vrot.lane.b32.xlu0 %v1892_v42, %s1654_s11  ;;  %v1198_v42 = vld [vmem:[%s2041_s5 + $0x28] sm:$0xff] }
 0x5ff   : > { %1097 = vrot.lane.b32.xlu0 %v1897_v43, %s1654_s11  ;;  %v1592_v43 = vpack.c.bf16 %v1198_v42, %v1197_v41 }
 0x601   : > { %1593 = vmatpush3.bf16.msra.mxu0 %v1592_v43 }
 0x602   : > { %1594 = vmatprep.subr.bf16.mxu0 %v1649_v6 }
 0x605   : > { %1596 = vmatpush3.bf16.msra.mxu0 %v1595_v46 }
 0x606   : > { %1597 = vmatprep.subr.bf16.mxu0 %v1649_v6 }
 0x609   : > { %1599 = vmatpush3.bf16.msra.mxu0 %v1598_v49 }
 0x60a   : > { %1600 = vmatprep.subr.bf16.mxu0 %v1649_v6 }
 0x60d   : > { %1602 = vmatpush3.bf16.msra.mxu0 %v1601_v52 }
 0x60e   : > { %1603 = vmatprep.subr.bf16.mxu0 %v1649_v6 }
 0x611   : > { %1605 = vmatpush3.bf16.msra.mxu0 %v1604_v56 }
 0x612   : > { %1606 = vmatprep.subr.bf16.mxu0 %v1649_v6 }
 0x615   : > { %1608 = vmatpush3.bf16.msra.mxu0 %v1607_v60 }
 0x61e   : > { %763 = vadd.xlane.f32.xlu0 %v762_v10 }
 0x672   : > { %v924_v11 = vpop.xlane.xlu0 %923 }
 0x673   : > { %v925_v12 = vsub.f32 %v918_v7, %v924_v11 }
 0x675   : > { %v926_v13 = vmul.f32 1.442695, %v925_v12  ;;  %v1366_v12 = vld [vmem:[%s2042_s6] ss:$0 sm:$0xff] }
 0x676   : > { %v1013_v14 = vpop.permute.xlu0 %1012 }
 0x677   : > { %1629 = vpow2.f32 %v926_v13 }
 0x67a   : > { %v1098_v17 = vpop.permute.xlu0 %1097 }
 0x681   : > { %v1630_v15 = vpop.eup %1629 }
 0x682   : > { %1482 = vmatmul.mubr.msk.f32.vlgmr.msra.gmra.mrb[12].mxu1 %vm599_vm4, %v1630_v15  ;;  %v928_v23 = vsel %vm589_vm3, %v1630_v15, 0.0 }
 0x683   : > { %1485 = vmatpush3.xpose.msk.msra.mxu1 %vm512_vm2, %v1013_v14  ;;  %1486 = vmatprep.mubr.msk.f32.mxu1 %vm1651_vm1, %v1650_v59 }
 0x684   : > { %1489 = vmatprep.subr.mxu1 %v1650_v59 }
 0x686   : > { %1487 = vmatmul.mubr.msk.f32.vlgmr.msra.gmra.mrb[14].mxu1 %vm512_vm2, %v1011_v16 }
 0x687   : > { %1490 = vmatpush3.msk.msra.mxu1 %vm277_vm0, %v1098_v17  ;;  %1491 = vmatprep.mubr.msk.f32.mxu1 %vm1651_vm1, %v1650_v59 }
 0x6ab   : > { %v764_v31 = vpop.xlane.xlu0 %763 }
 0x755   : > { %v1004_v18 = vpop.f32.mrb[12].mxu1 }
 0x756   : > { %v1483_v19 = vpop.f32.mrb[13].mxu1 }
 0x759   : > { %v1084_v20 = vpop.f32.mrb[14].mxu1 }
 0x75a   : > { %v1488_v21 = vpop.f32.mrb[15].mxu1  ;;  %v1088_v22 = vsel %vm589_vm3, %v1084_v20, -inf }
 0x75b   : > { %1089 = vmax.xlane.f32.xlu1 %v1088_v22 }
 0x75f   : > { %929 = vadd.xlane.f32.xlu1 %v928_v23 }
 0x7e8   : > { %v1090_v24 = vpop.xlane.xlu1 %1089 }
 0x7e9   : > { %v1091_v25 = vsub.f32 %v1084_v20, %v1090_v24 }
 0x7eb   : > { %v1092_v26 = vmul.f32 1.442695, %v1091_v25 }
 0x7ec   : > { %v930_v27 = vpop.xlane.xlu1 %929 }
 0x7ed   : > { %1631 = vpow2.f32 %v1092_v26 }
 0x7ee   : > { %1633 = vrcp.f32 %v930_v27 }
 0x7ef   : > { %1635 = vrcp.f32 %v764_v31 }
 0x7f7   : > { %v1632_v28 = vpop.eup %1631 }
 0x7f8   : > { %v1634_v29 = vpop.eup %1633  ;;  %1492 = vmatmul.mubr.msk.f32.vlgmr.msra.gmra.mrb[16].mxu1 %vm599_vm4, %v1632_v28  ;;  %v1094_v59 = vsel %vm589_vm3, %v1632_v28, 0.0 }
 0x7f9   : > { %1095 = vadd.xlane.f32.xlu1 %v1094_v59  ;;  %v1009_v30 = vmul.f32 %v1634_v29, %v1004_v18  ;;  %v1636_v33 = vpop.eup %1635 }
 0x7fa   : > { %v843_v34 = vmul.f32 %v1636_v33, %v838_v4 }
 0x7fb   : > { %1181 = vrot.lane.b32.xlu0 %v1009_v30, %s1653_s10 }
 0x7fd   : > { %597 = vadd.xlane.f32.xlu1 %v596_v32 }
 0x80e   : > { %1177 = vrot.lane.b32.xlu1 %v843_v34, %s1654_s11 }
 0x86d   : > { %v1182_v6 = vpop.permute.xlu0 %1181 }
 0x886   : > { %v1096_v61 = vpop.xlane.xlu1 %1095 }
 0x887   : > { %1637 = vrcp.f32 %v1096_v61 }
 0x88a   : > { %v598_v3 = vpop.xlane.xlu1 %597 }
 0x88b   : > { %1639 = vrcp.f32 %v598_v3 }
 0x88e   : > { %v1178_v7 = vpop.permute.xlu1 %1177 }
 0x891   : > { %v1638_v62 = vpop.eup %1637 }
 0x895   : > { %v1640_v4 = vpop.eup %1639 }
 0x896   : > { %v677_v5 = vmul.f32 %v1640_v4, %v1927_v54 }
 0x898   : > { %v1188_v8 = vsel %vm512_vm2, %v677_v5, %v1178_v7 }
 0x899   : > { %v1190_v9 = vsel %vm1189_vm5, %v1188_v8, %v1182_v6 }
 0x8cb   : > { %v1170_v63 = vpop.f32.mrb[16].mxu1 }
 0x8cc   : > { %v1175_v1 = vmul.f32 %v1638_v62, %v1170_v63  ;;  %v1493_v2 = vpop.f32.mrb[17].mxu1 }
 0x8ce   : > { %1185 = vrot.lane.b32.xlu1 %v1175_v1, %s1652_s9 }
 0x940   : > { %v1186_v10 = vpop.permute.xlu1 %1185 }
 0x941   : > { %v1192_v11 = vsel %vm1191_vm6, %v1190_v9, %v1186_v10 }
 0x942   : > { %1527 = vmatmul.mubr.f32.vlgmr.msra.gmra.mrb[2].mxu0 %v1192_v11 }
 0xa15   : > { %v1282_v13 = vpop.f32.mrb[2].mxu0 }
 0xa16   : > { %v1283_v14 = vadd.f32 %v1366_v12, %v1282_v13  ;;  %v1528_v15 = vpop.f32.mrb[3].mxu0 }
 0xa18   : > { %v1286_v54 = vadd.f32 %v1283_v14, %v1711_v0 }
 0xa1a   : > { %1287 = vst [vmem:[%s273_s8] sm:$0x1f] %v1286_v54 }
 0xa1b PF: > { %s17_s24 = sadd.s32 1, %s1647_s24  }
 0xa1c   : > { %p14_p4 = scmp.ge.s32.totalorder %s17_s24, 4  }
 0xa1e   :  { %16 = sbr.rel (!%p14_p4) target bundleno = 1 (0x1), region = 78 }

</bundles_post_ra>
